<compile_context>
chip_gen: v6e
topology: v6e:2x2x1
jax: 0.10.0
libtpu: 0.0.40
codegen_flags: <defaults>
</compile_context>

<pallas_src>
import functools

import jax
import jax.numpy as jnp
from jax.experimental import pallas as pl
from jax.experimental.pallas import tpu as pltpu

LANE = 128
_BN_EPS = 1e-5


def _round_up(x, m):
    return (x + m - 1) // m * m


# --------------------------------------------------------------------------
# Pass 1: fused 3x3 conv (shift-and-accumulate, 9 MXU matmuls) + BN partial stats
# --------------------------------------------------------------------------
def _conv3x3_stats_kernel(x_ref, w_ref, out_ref, stat_ref):
    # x_ref:    (1, TH+2, W+2, Cin_p)  bf16  input row-tile with 1-px halo
    # w_ref:    (9, Cin_p, Cout_p)     bf16  per-tap weights (pinned in VMEM)
    # out_ref:  (1, TH, W, Cout_p)     f32   pre-BN conv output tile
    # stat_ref: (1, 2, Cout_p)         f32   per-tile (sum, sum-of-squares)
    th, wd, cout = out_ref.shape[1], out_ref.shape[2], out_ref.shape[3]
    cin = x_ref.shape[3]

    def tap_dot(ky, kx):
        tap = x_ref[0, ky:ky + th, kx:kx + wd, :].reshape(th * wd, cin)
        return jnp.dot(tap, w_ref[ky * 3 + kx],
                       preferred_element_type=jnp.float32)

    # NOTE: conv bias is intentionally omitted -- training-mode BatchNorm
    # subtracts the per-channel batch mean right after, cancelling it exactly.
    acc = tap_dot(0, 0)
    for ky in range(3):
        for kx in range(3):
            if ky == 0 and kx == 0:
                continue
            acc = acc + tap_dot(ky, kx)

    out_ref[0] = acc.reshape(th, wd, cout)

    ssum = jnp.sum(acc, axis=0, keepdims=True)        # (1, Cout_p)
    ssq = jnp.sum(acc * acc, axis=0, keepdims=True)   # (1, Cout_p)
    stat_ref[0] = jnp.concatenate([ssum, ssq], axis=0)


# --------------------------------------------------------------------------
# Pass 2: fused BatchNorm apply (single FMA per element) + ReLU
# --------------------------------------------------------------------------
def _bn_relu_kernel(y_ref, aff_ref, o_ref):
    # y_ref:   (1, TH, W, Cout_p) f32   pre-BN conv output tile
    # aff_ref: (2, Cout_p)        f32   row 0 = scale, row 1 = shift (pinned)
    # o_ref:   (1, TH, W, Cout_p)       normalized+ReLU output tile
    y = y_ref[...].astype(jnp.float32)
    s = aff_ref[0:1, :].reshape(1, 1, 1, -1)
    t = aff_ref[1:2, :].reshape(1, 1, 1, -1)
    o_ref[...] = jnp.maximum(y * s + t, 0.0).astype(o_ref.dtype)


# --------------------------------------------------------------------------
# Wrapper-side glue
# --------------------------------------------------------------------------
def _halo_row_tiles(x_nhwc, tile_h):
    """(N, H, W, C) -> (N*H//tile_h, tile_h+2, W+2, C) row tiles with 1-px halo.

    Pure data rearrangement done once per stage (vs. the 9x HBM blow-up of an
    im2col patch matrix); only 2 halo rows per tile are duplicated.
    """
    n, h, w, c = x_nhwc.shape
    xp = jnp.pad(x_nhwc, ((0, 0), (1, 1), (1, 1), (0, 0)))
    ntpi = h // tile_h
    tiles = [xp[:, t * tile_h: t * tile_h + tile_h + 2] for t in range(ntpi)]
    tiles = jnp.stack(tiles, axis=1)            # (N, ntpi, tile_h+2, W+2, C)
    return tiles.reshape(n * ntpi, tile_h + 2, w + 2, c)


def _pick_tile_h(h, w, cin_p, cout_p, budget_bytes=8 * 1024 * 1024):
    """Largest divisor of H whose double-buffered tile footprint fits a
    conservative (v7x-safe) VMEM budget."""
    wbytes = 2 * 9 * cin_p * cout_p * 2                     # bf16 weights (x2 bufs)
    best = 1
    for th in range(1, h + 1):
        if h % th:
            continue
        slab = 2 * (th + 2) * (w + 2) * cin_p * 2           # bf16 input slab
        outb = 2 * th * w * cout_p * 4                      # f32 conv output
        if wbytes + slab + outb <= budget_bytes:
            best = th
    return best


def _conv_bn_relu_stage(x_nhwc, w_oihw, gamma, beta, *, out_dtype, tile_h=None):
    """One Conv2d(3x3, pad=1) + BatchNorm2d(train) + ReLU stage.

    x_nhwc may already carry lane-padded (zero) channels; returns (y, cout) where
    y is NHWC with Cout padded to a multiple of 128 (padded channels are zero).
    """
    n, h, wd, cin_in = x_nhwc.shape
    cout, cin = int(w_oihw.shape[0]), int(w_oihw.shape[1])
    assert cin_in >= cin
    cin_p = _round_up(max(cin_in, cin), LANE)
    cout_p = _round_up(cout, LANE)

    x = x_nhwc
    if cin_p != cin_in:
        x = jnp.pad(x, ((0, 0), (0, 0), (0, 0), (0, cin_p - cin_in)))
    x = x.astype(jnp.bfloat16)

    # PyTorch weight (Cout, Cin, 3, 3) -> (9, Cin_p, Cout_p), zero-padded, bf16.
    wm = jnp.transpose(w_oihw, (2, 3, 1, 0)).reshape(9, cin, cout)
    wm = jnp.pad(wm, ((0, 0), (0, cin_p - cin), (0, cout_p - cout)))
    wm = wm.astype(jnp.bfloat16)

    th = tile_h if tile_h is not None else _pick_tile_h(h, wd, cin_p, cout_p)
    assert h % th == 0, (h, th)
    slabs = _halo_row_tiles(x, th)                  # (NT, th+2, W+2, Cin_p) bf16
    nt = slabs.shape[0]

    cparams = pltpu.CompilerParams(
        dimension_semantics=("parallel",),          # v7x megacore over row tiles
        vmem_limit_bytes=32 * 1024 * 1024,
    )

    conv_out, stats = pl.pallas_call(
        _conv3x3_stats_kernel,
        grid=(nt,),
        in_specs=[
            pl.BlockSpec((1, th + 2, wd + 2, cin_p), lambda i: (i, 0, 0, 0)),
            pl.BlockSpec((9, cin_p, cout_p), lambda i: (0, 0, 0)),  # pinned weights
        ],
        out_specs=[
            pl.BlockSpec((1, th, wd, cout_p), lambda i: (i, 0, 0, 0)),
            pl.BlockSpec((1, 2, cout_p), lambda i: (i, 0, 0)),
        ],
        out_shape=[
            jax.ShapeDtypeStruct((nt, th, wd, cout_p), jnp.float32),
            jax.ShapeDtypeStruct((nt, 2, cout_p), jnp.float32),
        ],
        compiler_params=cparams,
    )(slabs, wm)

    # Global training-mode BatchNorm statistics from per-tile partials (tiny).
    count = jnp.float32(n * h * wd)
    mean = jnp.sum(stats[:, 0, :], axis=0) / count
    var = jnp.maximum(jnp.sum(stats[:, 1, :], axis=0) / count - mean * mean, 0.0)
    # Pad gamma/beta with zeros so padded output channels stay exactly zero.
    gamma_p = jnp.pad(gamma.astype(jnp.float32), (0, cout_p - cout))
    beta_p = jnp.pad(beta.astype(jnp.float32), (0, cout_p - cout))
    scale = gamma_p * jax.lax.rsqrt(var + _BN_EPS)
    shift = beta_p - mean * scale
    aff = jnp.stack([scale, shift], axis=0)         # (2, Cout_p)

    y = pl.pallas_call(
        _bn_relu_kernel,
        grid=(nt,),
        in_specs=[
            pl.BlockSpec((1, th, wd, cout_p), lambda i: (i, 0, 0, 0)),
            pl.BlockSpec((2, cout_p), lambda i: (0, 0)),            # pinned affine
        ],
        out_specs=pl.BlockSpec((1, th, wd, cout_p), lambda i: (i, 0, 0, 0)),
        out_shape=jax.ShapeDtypeStruct((nt, th, wd, cout_p), out_dtype),
        compiler_params=cparams,
    )(conv_out, aff)

    return y.reshape(n, h, wd, cout_p), cout


def conv_block1_forward(x_nchw, params, *, tile_h=None):
    """Equivalent of conv_block1.forward: (N, Cin, H, W) -> (N, Cout, H, W)."""
    x = jnp.transpose(x_nchw, (0, 2, 3, 1))         # single NCHW->NHWC at entry
    # Inter-stage activation stays in lane-padded NHWC bf16 (no layout round-trip).
    y, _ = _conv_bn_relu_stage(x, params["w1"], params["g1"], params["beta1"],
                               out_dtype=jnp.bfloat16, tile_h=tile_h)
    y, c2 = _conv_bn_relu_stage(y, params["w2"], params["g2"], params["beta2"],
                                out_dtype=jnp.float32, tile_h=tile_h)
    y = y[..., :c2]                                 # strip channel padding
    return jnp.transpose(y, (0, 3, 1, 2))           # NHWC->NCHW at exit


def init_params(key, ch_in, ch_out, dtype=jnp.float32):
    """Mirror nn.Conv2d default init (uniform +-1/sqrt(fan_in)) and fresh
    nn.BatchNorm2d (gamma=1, beta=0). Biases are kept for the reference; the
    kernel path omits them (exactly cancelled by training-mode BN)."""
    k1, k2, k3, k4 = jax.random.split(key, 4)
    bound1 = 1.0 / jnp.sqrt(ch_in * 9)
    bound2 = 1.0 / jnp.sqrt(ch_out * 9)
    return {
        "w1": jax.random.uniform(k1, (ch_out, ch_in, 3, 3), dtype, -bound1, bound1),
        "b1": jax.random.uniform(k2, (ch_out,), dtype, -bound1, bound1),
        "g1": jnp.ones((ch_out,), dtype),
        "beta1": jnp.zeros((ch_out,), dtype),
        "w2": jax.random.uniform(k3, (ch_out, ch_out, 3, 3), dtype, -bound2, bound2),
        "b2": jax.random.uniform(k4, (ch_out,), dtype, -bound2, bound2),
        "g2": jnp.ones((ch_out,), dtype),
        "beta2": jnp.zeros((ch_out,), dtype),
    }


# --------------------------------------------------------------------------
# Pure-JAX f32 reference (with bias, like the PyTorch module) for sanity check
# --------------------------------------------------------------------------
def _reference_forward(x_nchw, params):
    def stage(x, w, b, g, beta):
        y = jax.lax.conv_general_dilated(
            x, w, window_strides=(1, 1), padding="SAME",
            dimension_numbers=("NCHW", "OIHW", "NCHW"),
            precision=jax.lax.Precision.HIGHEST)
        y = y + b[None, :, None, None]
        mean = jnp.mean(y, axis=(0, 2, 3), keepdims=True)
        var = jnp.mean(jnp.square(y - mean), axis=(0, 2, 3), keepdims=True)
        y = (y - mean) * jax.lax.rsqrt(var + _BN_EPS)
        y = y * g[None, :, None, None] + beta[None, :, None, None]
        return jnp.maximum(y, 0.0)

    x = stage(x_nchw, params["w1"], params["b1"], params["g1"], params["beta1"])
    x = stage(x, params["w2"], params["b2"], params["g2"], params["beta2"])
    return x


if __name__ == "__main__":
    N, CH_IN, CH_OUT, H, W = 2, 4, 8, 16, 16

    key = jax.random.PRNGKey(0)
    kx, kp = jax.random.split(key)
    x = jax.random.normal(kx, (N, CH_IN, H, W), dtype=jnp.float32)
    params = init_params(kp, CH_IN, CH_OUT)

    # tile_h=8 -> 2 row tiles per image (4 grid steps): exercises the tiled
    # partial-stat BatchNorm path as well as the pipelined grid.
    fwd = jax.jit(functools.partial(conv_block1_forward, tile_h=8))
    out = jax.block_until_ready(fwd(x, params))

    assert out.shape == (N, CH_OUT, H, W), out.shape
    assert out.dtype == jnp.float32, out.dtype

    ref = _reference_forward(x, params)
    err = float(jnp.max(jnp.abs(out - ref)))
    # bf16 MXU operands vs. f32 reference -> allow a modest tolerance.
    assert err < 5e-2, f"max abs diff vs reference too large: {err}"

    print("KERNEL_OK")
</pallas_src>

<mosaic_0001>
module attributes {stable_mosaic.version = 11 : i64} {
  func.func @_conv3x3_stats_kernel(%arg0: i32, %arg1: memref<1x10x18x128xbf16, #tpu.memory_space<vmem>>, %arg2: memref<9x128x128xbf16, #tpu.memory_space<vmem>>, %arg3: memref<1x8x16x128xf32, #tpu.memory_space<vmem>>, %arg4: memref<1x2x128xf32, #tpu.memory_space<vmem>>) attributes {dimension_semantics = [#tpu.dimension_semantics<parallel>], iteration_bounds = array<i64: 4>, scalar_prefetch = 0 : i64, scratch_operands = 0 : i64, tpu.core_type = #tpu.core_type<tc>, window_params = [{transform_indices = @transform_0, window_bounds = array<i64: 1, 10, 18, 128>}, {pipeline_mode = #tpu.pipeline_mode<synchronous>, transform_indices = @transform_1, window_bounds = array<i64: 9, 128, 128>}, {transform_indices = @transform_2, window_bounds = array<i64: 1, 8, 16, 128>}, {transform_indices = @transform_3, window_bounds = array<i64: 1, 2, 128>}]} {
    %c0 = arith.constant 0 : index
    %c0_0 = arith.constant 0 : index
    %c0_1 = arith.constant 0 : index
    %c0_2 = arith.constant 0 : index
    %0 = vector.load %arg1[%c0, %c0_0, %c0_1, %c0_2] : memref<1x10x18x128xbf16, #tpu.memory_space<vmem>>, vector<1x8x16x128xbf16>
    %1 = vector.shape_cast %0 : vector<1x8x16x128xbf16> to vector<8x16x128xbf16>
    %2 = vector.shape_cast %1 : vector<8x16x128xbf16> to vector<128x128xbf16>
    %c0_3 = arith.constant 0 : index
    %c0_4 = arith.constant 0 : index
    %c0_5 = arith.constant 0 : index
    %3 = vector.load %arg2[%c0_3, %c0_4, %c0_5] : memref<9x128x128xbf16, #tpu.memory_space<vmem>>, vector<1x128x128xbf16>
    %4 = vector.shape_cast %3 : vector<1x128x128xbf16> to vector<128x128xbf16>
    %cst = arith.constant dense<0.000000e+00> : vector<128x128xf32>
    %5 = tpu.matmul %2, %4, %cst {dimension_numbers = #tpu.dot_dimension_numbers<[1], [0], [0], [1], [0, 0, 1, 1], [], []>} : vector<128x128xbf16>, vector<128x128xbf16>, vector<128x128xf32> -> vector<128x128xf32>
    %c0_6 = arith.constant 0 : index
    %c0_7 = arith.constant 0 : index
    %c1 = arith.constant 1 : index
    %c0_8 = arith.constant 0 : index
    %6 = vector.load %arg1[%c0_6, %c0_7, %c1, %c0_8] : memref<1x10x18x128xbf16, #tpu.memory_space<vmem>>, vector<1x8x16x128xbf16>
    %7 = vector.shape_cast %6 : vector<1x8x16x128xbf16> to vector<8x16x128xbf16>
    %8 = vector.shape_cast %7 : vector<8x16x128xbf16> to vector<128x128xbf16>
    %c1_9 = arith.constant 1 : index
    %c0_10 = arith.constant 0 : index
    %c0_11 = arith.constant 0 : index
    %9 = vector.load %arg2[%c1_9, %c0_10, %c0_11] : memref<9x128x128xbf16, #tpu.memory_space<vmem>>, vector<1x128x128xbf16>
    %10 = vector.shape_cast %9 : vector<1x128x128xbf16> to vector<128x128xbf16>
    %cst_12 = arith.constant dense<0.000000e+00> : vector<128x128xf32>
    %11 = tpu.matmul %8, %10, %cst_12 {dimension_numbers = #tpu.dot_dimension_numbers<[1], [0], [0], [1], [0, 0, 1, 1], [], []>} : vector<128x128xbf16>, vector<128x128xbf16>, vector<128x128xf32> -> vector<128x128xf32>
    %12 = arith.addf %5, %11 : vector<128x128xf32>
    %c0_13 = arith.constant 0 : index
    %c0_14 = arith.constant 0 : index
    %c2 = arith.constant 2 : index
    %c0_15 = arith.constant 0 : index
    %13 = vector.load %arg1[%c0_13, %c0_14, %c2, %c0_15] : memref<1x10x18x128xbf16, #tpu.memory_space<vmem>>, vector<1x8x16x128xbf16>
    %14 = vector.shape_cast %13 : vector<1x8x16x128xbf16> to vector<8x16x128xbf16>
    %15 = vector.shape_cast %14 : vector<8x16x128xbf16> to vector<128x128xbf16>
    %c2_16 = arith.constant 2 : index
    %c0_17 = arith.constant 0 : index
    %c0_18 = arith.constant 0 : index
    %16 = vector.load %arg2[%c2_16, %c0_17, %c0_18] : memref<9x128x128xbf16, #tpu.memory_space<vmem>>, vector<1x128x128xbf16>
    %17 = vector.shape_cast %16 : vector<1x128x128xbf16> to vector<128x128xbf16>
    %cst_19 = arith.constant dense<0.000000e+00> : vector<128x128xf32>
    %18 = tpu.matmul %15, %17, %cst_19 {dimension_numbers = #tpu.dot_dimension_numbers<[1], [0], [0], [1], [0, 0, 1, 1], [], []>} : vector<128x128xbf16>, vector<128x128xbf16>, vector<128x128xf32> -> vector<128x128xf32>
    %19 = arith.addf %12, %18 : vector<128x128xf32>
    %c0_20 = arith.constant 0 : index
    %c1_21 = arith.constant 1 : index
    %c0_22 = arith.constant 0 : index
    %c0_23 = arith.constant 0 : index
    %20 = vector.load %arg1[%c0_20, %c1_21, %c0_22, %c0_23] : memref<1x10x18x128xbf16, #tpu.memory_space<vmem>>, vector<1x8x16x128xbf16>
    %21 = vector.shape_cast %20 : vector<1x8x16x128xbf16> to vector<8x16x128xbf16>
    %22 = vector.shape_cast %21 : vector<8x16x128xbf16> to vector<128x128xbf16>
    %c3 = arith.constant 3 : index
    %c0_24 = arith.constant 0 : index
    %c0_25 = arith.constant 0 : index
    %23 = vector.load %arg2[%c3, %c0_24, %c0_25] : memref<9x128x128xbf16, #tpu.memory_space<vmem>>, vector<1x128x128xbf16>
    %24 = vector.shape_cast %23 : vector<1x128x128xbf16> to vector<128x128xbf16>
    %cst_26 = arith.constant dense<0.000000e+00> : vector<128x128xf32>
    %25 = tpu.matmul %22, %24, %cst_26 {dimension_numbers = #tpu.dot_dimension_numbers<[1], [0], [0], [1], [0, 0, 1, 1], [], []>} : vector<128x128xbf16>, vector<128x128xbf16>, vector<128x128xf32> -> vector<128x128xf32>
    %26 = arith.addf %19, %25 : vector<128x128xf32>
    %c0_27 = arith.constant 0 : index
    %c1_28 = arith.constant 1 : index
    %c1_29 = arith.constant 1 : index
    %c0_30 = arith.constant 0 : index
    %27 = vector.load %arg1[%c0_27, %c1_28, %c1_29, %c0_30] : memref<1x10x18x128xbf16, #tpu.memory_space<vmem>>, vector<1x8x16x128xbf16>
    %28 = vector.shape_cast %27 : vector<1x8x16x128xbf16> to vector<8x16x128xbf16>
    %29 = vector.shape_cast %28 : vector<8x16x128xbf16> to vector<128x128xbf16>
    %c4 = arith.constant 4 : index
    %c0_31 = arith.constant 0 : index
    %c0_32 = arith.constant 0 : index
    %30 = vector.load %arg2[%c4, %c0_31, %c0_32] : memref<9x128x128xbf16, #tpu.memory_space<vmem>>, vector<1x128x128xbf16>
    %31 = vector.shape_cast %30 : vector<1x128x128xbf16> to vector<128x128xbf16>
    %cst_33 = arith.constant dense<0.000000e+00> : vector<128x128xf32>
    %32 = tpu.matmul %29, %31, %cst_33 {dimension_numbers = #tpu.dot_dimension_numbers<[1], [0], [0], [1], [0, 0, 1, 1], [], []>} : vector<128x128xbf16>, vector<128x128xbf16>, vector<128x128xf32> -> vector<128x128xf32>
    %33 = arith.addf %26, %32 : vector<128x128xf32>
    %c0_34 = arith.constant 0 : index
    %c1_35 = arith.constant 1 : index
    %c2_36 = arith.constant 2 : index
    %c0_37 = arith.constant 0 : index
    %34 = vector.load %arg1[%c0_34, %c1_35, %c2_36, %c0_37] : memref<1x10x18x128xbf16, #tpu.memory_space<vmem>>, vector<1x8x16x128xbf16>
    %35 = vector.shape_cast %34 : vector<1x8x16x128xbf16> to vector<8x16x128xbf16>
    %36 = vector.shape_cast %35 : vector<8x16x128xbf16> to vector<128x128xbf16>
    %c5 = arith.constant 5 : index
    %c0_38 = arith.constant 0 : index
    %c0_39 = arith.constant 0 : index
    %37 = vector.load %arg2[%c5, %c0_38, %c0_39] : memref<9x128x128xbf16, #tpu.memory_space<vmem>>, vector<1x128x128xbf16>
    %38 = vector.shape_cast %37 : vector<1x128x128xbf16> to vector<128x128xbf16>
    %cst_40 = arith.constant dense<0.000000e+00> : vector<128x128xf32>
    %39 = tpu.matmul %36, %38, %cst_40 {dimension_numbers = #tpu.dot_dimension_numbers<[1], [0], [0], [1], [0, 0, 1, 1], [], []>} : vector<128x128xbf16>, vector<128x128xbf16>, vector<128x128xf32> -> vector<128x128xf32>
    %40 = arith.addf %33, %39 : vector<128x128xf32>
    %c0_41 = arith.constant 0 : index
    %c2_42 = arith.constant 2 : index
    %c0_43 = arith.constant 0 : index
    %c0_44 = arith.constant 0 : index
    %41 = vector.load %arg1[%c0_41, %c2_42, %c0_43, %c0_44] : memref<1x10x18x128xbf16, #tpu.memory_space<vmem>>, vector<1x8x16x128xbf16>
    %42 = vector.shape_cast %41 : vector<1x8x16x128xbf16> to vector<8x16x128xbf16>
    %43 = vector.shape_cast %42 : vector<8x16x128xbf16> to vector<128x128xbf16>
    %c6 = arith.constant 6 : index
    %c0_45 = arith.constant 0 : index
    %c0_46 = arith.constant 0 : index
    %44 = vector.load %arg2[%c6, %c0_45, %c0_46] : memref<9x128x128xbf16, #tpu.memory_space<vmem>>, vector<1x128x128xbf16>
    %45 = vector.shape_cast %44 : vector<1x128x128xbf16> to vector<128x128xbf16>
    %cst_47 = arith.constant dense<0.000000e+00> : vector<128x128xf32>
    %46 = tpu.matmul %43, %45, %cst_47 {dimension_numbers = #tpu.dot_dimension_numbers<[1], [0], [0], [1], [0, 0, 1, 1], [], []>} : vector<128x128xbf16>, vector<128x128xbf16>, vector<128x128xf32> -> vector<128x128xf32>
    %47 = arith.addf %40, %46 : vector<128x128xf32>
    %c0_48 = arith.constant 0 : index
    %c2_49 = arith.constant 2 : index
    %c1_50 = arith.constant 1 : index
    %c0_51 = arith.constant 0 : index
    %48 = vector.load %arg1[%c0_48, %c2_49, %c1_50, %c0_51] : memref<1x10x18x128xbf16, #tpu.memory_space<vmem>>, vector<1x8x16x128xbf16>
    %49 = vector.shape_cast %48 : vector<1x8x16x128xbf16> to vector<8x16x128xbf16>
    %50 = vector.shape_cast %49 : vector<8x16x128xbf16> to vector<128x128xbf16>
    %c7 = arith.constant 7 : index
    %c0_52 = arith.constant 0 : index
    %c0_53 = arith.constant 0 : index
    %51 = vector.load %arg2[%c7, %c0_52, %c0_53] : memref<9x128x128xbf16, #tpu.memory_space<vmem>>, vector<1x128x128xbf16>
    %52 = vector.shape_cast %51 : vector<1x128x128xbf16> to vector<128x128xbf16>
    %cst_54 = arith.constant dense<0.000000e+00> : vector<128x128xf32>
    %53 = tpu.matmul %50, %52, %cst_54 {dimension_numbers = #tpu.dot_dimension_numbers<[1], [0], [0], [1], [0, 0, 1, 1], [], []>} : vector<128x128xbf16>, vector<128x128xbf16>, vector<128x128xf32> -> vector<128x128xf32>
    %54 = arith.addf %47, %53 : vector<128x128xf32>
    %c0_55 = arith.constant 0 : index
    %c2_56 = arith.constant 2 : index
    %c2_57 = arith.constant 2 : index
    %c0_58 = arith.constant 0 : index
    %55 = vector.load %arg1[%c0_55, %c2_56, %c2_57, %c0_58] : memref<1x10x18x128xbf16, #tpu.memory_space<vmem>>, vector<1x8x16x128xbf16>
    %56 = vector.shape_cast %55 : vector<1x8x16x128xbf16> to vector<8x16x128xbf16>
    %57 = vector.shape_cast %56 : vector<8x16x128xbf16> to vector<128x128xbf16>
    %c8 = arith.constant 8 : index
    %c0_59 = arith.constant 0 : index
    %c0_60 = arith.constant 0 : index
    %58 = vector.load %arg2[%c8, %c0_59, %c0_60] : memref<9x128x128xbf16, #tpu.memory_space<vmem>>, vector<1x128x128xbf16>
    %59 = vector.shape_cast %58 : vector<1x128x128xbf16> to vector<128x128xbf16>
    %cst_61 = arith.constant dense<0.000000e+00> : vector<128x128xf32>
    %60 = tpu.matmul %57, %59, %cst_61 {dimension_numbers = #tpu.dot_dimension_numbers<[1], [0], [0], [1], [0, 0, 1, 1], [], []>} : vector<128x128xbf16>, vector<128x128xbf16>, vector<128x128xf32> -> vector<128x128xf32>
    %61 = arith.addf %54, %60 : vector<128x128xf32>
    %62 = vector.shape_cast %61 : vector<128x128xf32> to vector<8x16x128xf32>
    %c0_62 = arith.constant 0 : index
    %c0_63 = arith.constant 0 : index
    %c0_64 = arith.constant 0 : index
    %c0_65 = arith.constant 0 : index
    %63 = vector.load %arg3[%c0_62, %c0_63, %c0_64, %c0_65] : memref<1x8x16x128xf32, #tpu.memory_space<vmem>>, vector<1x8x16x128xf32>
    %64 = vector.shape_cast %63 : vector<1x8x16x128xf32> to vector<8x16x128xf32>
    %65 = vector.shape_cast %62 : vector<8x16x128xf32> to vector<1x8x16x128xf32>
    tpu.vector_store %arg3[%c0_62, %c0_63, %c0_64, %c0_65], %65 {strides = array<i32>} : memref<1x8x16x128xf32, #tpu.memory_space<vmem>>, vector<1x8x16x128xf32>,
    %cst_66 = arith.constant dense<0.000000e+00> : vector<128xf32>
    %66 = vector.multi_reduction <add>, %61, %cst_66 [0] : vector<128x128xf32> to vector<128xf32>
    %67 = vector.shape_cast %66 : vector<128xf32> to vector<1x128xf32>
    %68 = arith.mulf %61, %61 : vector<128x128xf32>
    %cst_67 = arith.constant dense<0.000000e+00> : vector<128xf32>
    %69 = vector.multi_reduction <add>, %68, %cst_67 [0] : vector<128x128xf32> to vector<128xf32>
    %70 = vector.shape_cast %69 : vector<128xf32> to vector<1x128xf32>
    %71 = tpu.concatenate %67, %70 in 0 : vector<1x128xf32>, vector<1x128xf32> -> vector<2x128xf32>
    %c0_68 = arith.constant 0 : index
    %c0_69 = arith.constant 0 : index
    %c0_70 = arith.constant 0 : index
    %72 = vector.load %arg4[%c0_68, %c0_69, %c0_70] : memref<1x2x128xf32, #tpu.memory_space<vmem>>, vector<1x2x128xf32>
    %73 = vector.shape_cast %72 : vector<1x2x128xf32> to vector<2x128xf32>
    %74 = vector.shape_cast %71 : vector<2x128xf32> to vector<1x2x128xf32>
    tpu.vector_store %arg4[%c0_68, %c0_69, %c0_70], %74 {strides = array<i32>} : memref<1x2x128xf32, #tpu.memory_space<vmem>>, vector<1x2x128xf32>,
    return
  }
  func.func @transform_0(%arg0: i32) -> (i32, i32, i32, i32) {
    %c0_i32 = arith.constant 0 : i32
    %c0_i32_0 = arith.constant 0 : i32
    %c0_i32_1 = arith.constant 0 : i32
    %c0_i32_2 = arith.constant 0 : i32
    return %arg0, %c0_i32, %c0_i32_0, %c0_i32_1 : i32, i32, i32, i32
  }
  func.func @transform_1(%arg0: i32) -> (i32, i32, i32) {
    %c0_i32 = arith.constant 0 : i32
    %c0_i32_0 = arith.constant 0 : i32
    %c0_i32_1 = arith.constant 0 : i32
    %c0_i32_2 = arith.constant 0 : i32
    return %c0_i32, %c0_i32_0, %c0_i32_1 : i32, i32, i32
  }
  func.func @transform_2(%arg0: i32) -> (i32, i32, i32, i32) {
    %c0_i32 = arith.constant 0 : i32
    %c0_i32_0 = arith.constant 0 : i32
    %c0_i32_1 = arith.constant 0 : i32
    %c0_i32_2 = arith.constant 0 : i32
    return %arg0, %c0_i32, %c0_i32_0, %c0_i32_1 : i32, i32, i32, i32
  }
  func.func @transform_3(%arg0: i32) -> (i32, i32, i32) {
    %c0_i32 = arith.constant 0 : i32
    %c0_i32_0 = arith.constant 0 : i32
    %c0_i32_1 = arith.constant 0 : i32
    return %arg0, %c0_i32, %c0_i32_0 : i32, i32, i32
  }
}

module attributes {stable_mosaic.version = 11 : i64} {
  func.func @_bn_relu_kernel(%arg0: i32, %arg1: memref<1x8x16x128xf32, #tpu.memory_space<vmem>>, %arg2: memref<2x128xf32, #tpu.memory_space<vmem>>, %arg3: memref<1x8x16x128xbf16, #tpu.memory_space<vmem>>) attributes {dimension_semantics = [#tpu.dimension_semantics<parallel>], iteration_bounds = array<i64: 4>, scalar_prefetch = 0 : i64, scratch_operands = 0 : i64, tpu.core_type = #tpu.core_type<tc>, window_params = [{transform_indices = @transform_0, window_bounds = array<i64: 1, 8, 16, 128>}, {pipeline_mode = #tpu.pipeline_mode<synchronous>, transform_indices = @transform_1, window_bounds = array<i64: 2, 128>}, {transform_indices = @transform_2, window_bounds = array<i64: 1, 8, 16, 128>}]} {
    %c0 = arith.constant 0 : index
    %c0_0 = arith.constant 0 : index
    %c0_1 = arith.constant 0 : index
    %c0_2 = arith.constant 0 : index
    %0 = vector.load %arg1[%c0, %c0_0, %c0_1, %c0_2] : memref<1x8x16x128xf32, #tpu.memory_space<vmem>>, vector<1x8x16x128xf32>
    %c0_3 = arith.constant 0 : index
    %c0_4 = arith.constant 0 : index
    %1 = vector.load %arg2[%c0_3, %c0_4] : memref<2x128xf32, #tpu.memory_space<vmem>>, vector<1x128xf32>
    %2 = vector.shape_cast %1 : vector<1x128xf32> to vector<1x1x1x128xf32>
    %c1 = arith.constant 1 : index
    %c0_5 = arith.constant 0 : index
    %3 = vector.load %arg2[%c1, %c0_5] : memref<2x128xf32, #tpu.memory_space<vmem>>, vector<1x128xf32>
    %4 = vector.shape_cast %3 : vector<1x128xf32> to vector<1x1x1x128xf32>
    %5 = vector.broadcast %2 : vector<1x1x1x128xf32> to vector<1x8x16x128xf32>
    %6 = arith.mulf %0, %5 : vector<1x8x16x128xf32>
    %7 = vector.broadcast %4 : vector<1x1x1x128xf32> to vector<1x8x16x128xf32>
    %8 = arith.addf %6, %7 : vector<1x8x16x128xf32>
    %cst = arith.constant 0.000000e+00 : f32
    %9 = vector.broadcast %cst : f32 to vector<1x8x16x128xf32>
    %10 = arith.maximumf %8, %9 : vector<1x8x16x128xf32>
    %11 = arith.truncf %10 : vector<1x8x16x128xf32> to vector<1x8x16x128xbf16>
    %c0_6 = arith.constant 0 : index
    %c0_7 = arith.constant 0 : index
    %c0_8 = arith.constant 0 : index
    %c0_9 = arith.constant 0 : index
    %12 = vector.load %arg3[%c0_6, %c0_7, %c0_8, %c0_9] : memref<1x8x16x128xbf16, #tpu.memory_space<vmem>>, vector<1x8x16x128xbf16>
    tpu.vector_store %arg3[%c0_6, %c0_7, %c0_8, %c0_9], %11 {strides = array<i32>} : memref<1x8x16x128xbf16, #tpu.memory_space<vmem>>, vector<1x8x16x128xbf16>,
    return
  }
  func.func @transform_0(%arg0: i32) -> (i32, i32, i32, i32) {
    %c0_i32 = arith.constant 0 : i32
    %c0_i32_0 = arith.constant 0 : i32
    %c0_i32_1 = arith.constant 0 : i32
    %c0_i32_2 = arith.constant 0 : i32
    return %arg0, %c0_i32, %c0_i32_0, %c0_i32_1 : i32, i32, i32, i32
  }
  func.func @transform_1(%arg0: i32) -> (i32, i32) {
    %c0_i32 = arith.constant 0 : i32
    %c0_i32_0 = arith.constant 0 : i32
    %c0_i32_1 = arith.constant 0 : i32
    return %c0_i32, %c0_i32_0 : i32, i32
  }
  func.func @transform_2(%arg0: i32) -> (i32, i32, i32, i32) {
    %c0_i32 = arith.constant 0 : i32
    %c0_i32_0 = arith.constant 0 : i32
    %c0_i32_1 = arith.constant 0 : i32
    %c0_i32_2 = arith.constant 0 : i32
    return %arg0, %c0_i32, %c0_i32_0, %c0_i32_1 : i32, i32, i32, i32
  }
}

module attributes {stable_mosaic.version = 11 : i64} {
  func.func @_bn_relu_kernel(%arg0: i32, %arg1: memref<1x8x16x128xf32, #tpu.memory_space<vmem>>, %arg2: memref<2x128xf32, #tpu.memory_space<vmem>>, %arg3: memref<1x8x16x128xf32, #tpu.memory_space<vmem>>) attributes {dimension_semantics = [#tpu.dimension_semantics<parallel>], iteration_bounds = array<i64: 4>, scalar_prefetch = 0 : i64, scratch_operands = 0 : i64, tpu.core_type = #tpu.core_type<tc>, window_params = [{transform_indices = @transform_0, window_bounds = array<i64: 1, 8, 16, 128>}, {pipeline_mode = #tpu.pipeline_mode<synchronous>, transform_indices = @transform_1, window_bounds = array<i64: 2, 128>}, {transform_indices = @transform_2, window_bounds = array<i64: 1, 8, 16, 128>}]} {
    %c0 = arith.constant 0 : index
    %c0_0 = arith.constant 0 : index
    %c0_1 = arith.constant 0 : index
    %c0_2 = arith.constant 0 : index
    %0 = vector.load %arg1[%c0, %c0_0, %c0_1, %c0_2] : memref<1x8x16x128xf32, #tpu.memory_space<vmem>>, vector<1x8x16x128xf32>
    %c0_3 = arith.constant 0 : index
    %c0_4 = arith.constant 0 : index
    %1 = vector.load %arg2[%c0_3, %c0_4] : memref<2x128xf32, #tpu.memory_space<vmem>>, vector<1x128xf32>
    %2 = vector.shape_cast %1 : vector<1x128xf32> to vector<1x1x1x128xf32>
    %c1 = arith.constant 1 : index
    %c0_5 = arith.constant 0 : index
    %3 = vector.load %arg2[%c1, %c0_5] : memref<2x128xf32, #tpu.memory_space<vmem>>, vector<1x128xf32>
    %4 = vector.shape_cast %3 : vector<1x128xf32> to vector<1x1x1x128xf32>
    %5 = vector.broadcast %2 : vector<1x1x1x128xf32> to vector<1x8x16x128xf32>
    %6 = arith.mulf %0, %5 : vector<1x8x16x128xf32>
    %7 = vector.broadcast %4 : vector<1x1x1x128xf32> to vector<1x8x16x128xf32>
    %8 = arith.addf %6, %7 : vector<1x8x16x128xf32>
    %cst = arith.constant 0.000000e+00 : f32
    %9 = vector.broadcast %cst : f32 to vector<1x8x16x128xf32>
    %10 = arith.maximumf %8, %9 : vector<1x8x16x128xf32>
    %c0_6 = arith.constant 0 : index
    %c0_7 = arith.constant 0 : index
    %c0_8 = arith.constant 0 : index
    %c0_9 = arith.constant 0 : index
    %11 = vector.load %arg3[%c0_6, %c0_7, %c0_8, %c0_9] : memref<1x8x16x128xf32, #tpu.memory_space<vmem>>, vector<1x8x16x128xf32>
    tpu.vector_store %arg3[%c0_6, %c0_7, %c0_8, %c0_9], %10 {strides = array<i32>} : memref<1x8x16x128xf32, #tpu.memory_space<vmem>>, vector<1x8x16x128xf32>,
    return
  }
  func.func @transform_0(%arg0: i32) -> (i32, i32, i32, i32) {
    %c0_i32 = arith.constant 0 : i32
    %c0_i32_0 = arith.constant 0 : i32
    %c0_i32_1 = arith.constant 0 : i32
    %c0_i32_2 = arith.constant 0 : i32
    return %arg0, %c0_i32, %c0_i32_0, %c0_i32_1 : i32, i32, i32, i32
  }
  func.func @transform_1(%arg0: i32) -> (i32, i32) {
    %c0_i32 = arith.constant 0 : i32
    %c0_i32_0 = arith.constant 0 : i32
    %c0_i32_1 = arith.constant 0 : i32
    return %c0_i32, %c0_i32_0 : i32, i32
  }
  func.func @transform_2(%arg0: i32) -> (i32, i32, i32, i32) {
    %c0_i32 = arith.constant 0 : i32
    %c0_i32_0 = arith.constant 0 : i32
    %c0_i32_1 = arith.constant 0 : i32
    %c0_i32_2 = arith.constant 0 : i32
    return %arg0, %c0_i32, %c0_i32_0, %c0_i32_1 : i32, i32, i32, i32
  }
}

</mosaic_0001>

<bundles_post_ra>
// kernel: conv_block1_forward.5
= control target key start
LH: loop header
LB: loop body
LE: loop exit
PB: predicated region body
PF: predicated region fallthrough
CT: control target
= control target key end

     0   :  { %s478_s9 = smov 0   ;;  %s569_s0 = inlined_call_operand.vmem [shape: f32[4,8,16,128], index: 0, kind: input, shape index: {}]   ;;  %s570_s1 = inlined_call_operand.vmem [shape: f32[2,128], index: 1, kind: input, shape index: {}]   ;;  %s571_s2 = inlined_call_operand.vmem [shape: bf16[4,8,16,128], index: 2, kind: output, shape index: {}]  }
   0x1 LB: > { %s353_s10 = sadd.s32 4294967295, %s461_s9   ;;  %p357_p0 = scmp.ge.s32.totalorder %s461_s9, 1  ;;  %s461_s9 = sphi %s478_s9, %s12_s9  }
   0x2   : > { %p112_p1 = scmp.lt.s32.totalorder %s461_s9, 5 }
   0x4   : > { %p113_p2 = pnand %p357_p0, %p112_p1 }
   0x5   : > { %p134_p3 = scmp.lt.s32.totalorder (!%p113_p2), %s353_s10, 3 }
   0x6   : > { %116 = sbr.rel (%p113_p2) target bundleno = 35 (0x23), region = 28 }
   0xb   : > { %s573_s10 = smov (!%p134_p3, %s353_s10), 3  ;;  %v492_v0 = vld [vmem:[%s570_s1] ss:$0 sm:$0xff]  ;;  %v502_v1 = vld [vmem:[%s570_s1 + $0x1] ss:$0 sm:$0xff] }
   0xc   : > { %s382_s11 = sshll.u32 %s573_s10, 7  ;;  %s383_s19 = sshll.u32 %s573_s10, 6 }
   0xd   : > { %s497_s16 = scalar_lea.vmem %s569_s0, %s382_s11  ;;  %s534_s22 = scalar_lea.vmem %s571_s2, %s383_s19 }
   0xe   : > { %v144_v2 = vld [vmem:[%s497_s16] sm:$0xff]  ;;  %v145_v3 = vld [vmem:[%s497_s16 + $0x8] sm:$0xff]  ;;  %v146_v4 = vld [vmem:[%s497_s16 + $0x10] sm:$0xff] }
   0xf   : > { %v166_v5 = vmul.f32 %v492_v0, %v144_v2  ;;  %v167_v6 = vmul.f32 %v492_v0, %v145_v3  ;;  %v147_v7 = vld [vmem:[%s497_s16 + $0x18] sm:$0xff]  ;;  %v168_v8 = vmul.f32 %v492_v0, %v146_v4  ;;  %v148_v9 = vld [vmem:[%s497_s16 + $0x20] sm:$0xff]  ;;  %v149_v10 = vld [vmem:[%s497_s16 + $0x28] sm:$0xff] }
  0x10   : > { %v169_v11 = vmul.f32 %v492_v0, %v147_v7  ;;  %v170_v12 = vmul.f32 %v492_v0, %v148_v9  ;;  %v171_v13 = vmul.f32 %v492_v0, %v149_v10  ;;  %v150_v14 = vld [vmem:[%s497_s16 + $0x30] sm:$0xff]  ;;  %v151_v15 = vld [vmem:[%s497_s16 + $0x38] sm:$0xff]  ;;  %v152_v24 = vld [vmem:[%s497_s16 + $0x40] sm:$0xff] }
  0x11   : > { %v186_v16 = vadd.f32 %v502_v1, %v166_v5  ;;  %v187_v17 = vadd.f32 %v502_v1, %v167_v6  ;;  %v188_v18 = vadd.f32 %v502_v1, %v168_v8  ;;  %v172_v19 = vmul.f32 %v492_v0, %v150_v14  ;;  %v153_v25 = vld [vmem:[%s497_s16 + $0x48] sm:$0xff]  ;;  %v154_v30 = vld [vmem:[%s497_s16 + $0x50] sm:$0xff]  ;;  %v155_v35 = vld [vmem:[%s497_s16 + $0x58] sm:$0xff] }
  0x12   : > { %v189_v20 = vadd.f32 %v502_v1, %v169_v11  ;;  %v190_v21 = vadd.f32 %v502_v1, %v170_v12  ;;  %v191_v22 = vadd.f32 %v502_v1, %v171_v13  ;;  %v173_v23 = vmul.f32 %v492_v0, %v151_v15  ;;  %v156_v36 = vld [vmem:[%s497_s16 + $0x60] sm:$0xff]  ;;  %v157_v41 = vld [vmem:[%s497_s16 + $0x68] sm:$0xff]  ;;  %v158_v42 = vld [vmem:[%s497_s16 + $0x70] sm:$0xff] }
  0x13   : > { %v202_v26 = vmax.f32 %v186_v16, 0.0  ;;  %v203_v27 = vmax.f32 %v187_v17, 0.0  ;;  %v204_v28 = vmax.f32 %v188_v18, 0.0  ;;  %v192_v29 = vadd.f32 %v502_v1, %v172_v19  ;;  %v159_v51 = vld [vmem:[%s497_s16 + $0x78] sm:$0xff] }
  0x14   : > { %v205_v31 = vmax.f32 %v189_v20, 0.0  ;;  %v206_v32 = vmax.f32 %v190_v21, 0.0  ;;  %v207_v33 = vmax.f32 %v191_v22, 0.0  ;;  %v193_v34 = vadd.f32 %v502_v1, %v173_v23 }
  0x15   : > { %v403_v37 = vpack.c.bf16 %v203_v27, %v202_v26  ;;  %v208_v38 = vmax.f32 %v192_v29, 0.0  ;;  %v174_v39 = vmul.f32 %v492_v0, %v152_v24  ;;  %v175_v40 = vmul.f32 %v492_v0, %v153_v25 }
  0x16   : > { %v408_v43 = vpack.c.bf16 %v205_v31, %v204_v28  ;;  %v413_v44 = vpack.c.bf16 %v207_v33, %v206_v32  ;;  %v209_v45 = vmax.f32 %v193_v34, 0.0  ;;  %v176_v46 = vmul.f32 %v492_v0, %v154_v30 }
  0x17   : > { %404 = vst [vmem:[%s534_s22] sm:$0xff] %v403_v37   ;;  %v194_v47 = vadd.f32 %v502_v1, %v174_v39  ;;  %v195_v48 = vadd.f32 %v502_v1, %v175_v40  ;;  %v177_v49 = vmul.f32 %v492_v0, %v155_v35  ;;  %v178_v50 = vmul.f32 %v492_v0, %v156_v36 }
  0x18   : > { %440 = vst [vmem:[%s534_s22 + $0x8] sm:$0xff] %v408_v43   ;;  %441 = vst [vmem:[%s534_s22 + $0x10] sm:$0xff] %v413_v44   ;;  %v418_v52 = vpack.c.bf16 %v209_v45, %v208_v38  ;;  %v196_v53 = vadd.f32 %v502_v1, %v176_v46  ;;  %v179_v54 = vmul.f32 %v492_v0, %v157_v41 }
  0x19   : > { %v180_v55 = vmul.f32 %v492_v0, %v158_v42  ;;  %v210_v56 = vmax.f32 %v194_v47, 0.0  ;;  %v211_v57 = vmax.f32 %v195_v48, 0.0  ;;  %v197_v58 = vadd.f32 %v502_v1, %v177_v49 }
  0x1a   : > { %v198_v59 = vadd.f32 %v502_v1, %v178_v50  ;;  %442 = vst [vmem:[%s534_s22 + $0x18] sm:$0xff] %v418_v52   ;;  %v212_v60 = vmax.f32 %v196_v53, 0.0  ;;  %v199_v61 = vadd.f32 %v502_v1, %v179_v54  ;;  %v181_v62 = vmul.f32 %v492_v0, %v159_v51 }
  0x1b   : > { %v200_v63 = vadd.f32 %v502_v1, %v180_v55  ;;  %v423_v2 = vpack.c.bf16 %v211_v57, %v210_v56  ;;  %v213_v3 = vmax.f32 %v197_v58, 0.0 }
  0x1c   : > { %v214_v4 = vmax.f32 %v198_v59, 0.0  ;;  %v215_v5 = vmax.f32 %v199_v61, 0.0  ;;  %v201_v6 = vadd.f32 %v502_v1, %v181_v62 }
  0x1d   : > { %v216_v7 = vmax.f32 %v200_v63, 0.0  ;;  %443 = vst [vmem:[%s534_s22 + $0x20] sm:$0xff] %v423_v2   ;;  %v428_v8 = vpack.c.bf16 %v213_v3, %v212_v60 }
  0x1e   : > { %v433_v9 = vpack.c.bf16 %v215_v5, %v214_v4  ;;  %v217_v10 = vmax.f32 %v201_v6, 0.0 }
  0x1f   : > { %444 = vst [vmem:[%s534_s22 + $0x28] sm:$0xff] %v428_v8  }
  0x20   : > { %445 = vst [vmem:[%s534_s22 + $0x30] sm:$0xff] %v433_v9   ;;  %v438_v11 = vpack.c.bf16 %v217_v10, %v216_v7 }
  0x22   : > { %446 = vst [vmem:[%s534_s22 + $0x38] sm:$0xff] %v438_v11  }
  0x23 PF: > { %s12_s9 = sadd.s32 1, %s461_s9  }
  0x24   : > { %p9_p4 = scmp.ge.s32.totalorder %s12_s9, 6  }
  0x26   :  { %11 = sbr.rel (!%p9_p4) target bundleno = 1 (0x1), region = 58 }

// kernel: conv_block1_forward.7
= control target key start
LH: loop header
LB: loop body
LE: loop exit
PB: predicated region body
PF: predicated region fallthrough
CT: control target
= control target key end

     0   :  { %s335_s9 = smov 0   ;;  %s430_s0 = inlined_call_operand.vmem [shape: f32[4,8,16,128], index: 0, kind: input, shape index: {}]   ;;  %s431_s1 = inlined_call_operand.vmem [shape: f32[2,128], index: 1, kind: input, shape index: {}]   ;;  %s432_s2 = inlined_call_operand.vmem [shape: f32[4,8,16,128], index: 2, kind: output, shape index: {}]  }
   0x1 LB: > { %s289_s10 = sadd.s32 4294967295, %s318_s9   ;;  %p293_p0 = scmp.ge.s32.totalorder %s318_s9, 1  ;;  %s318_s9 = sphi %s335_s9, %s12_s9  }
   0x2   : > { %p112_p1 = scmp.lt.s32.totalorder %s318_s9, 5 }
   0x4   : > { %p113_p2 = pnand %p293_p0, %p112_p1 }
   0x5   : > { %p134_p3 = scmp.lt.s32.totalorder (!%p113_p2), %s289_s10, 3 }
   0x6   : > { %116 = sbr.rel (%p113_p2) target bundleno = 32 (0x20), region = 28 }
   0xb   : > { %s434_s10 = smov (!%p134_p3, %s289_s10), 3  ;;  %v346_v0 = vld [vmem:[%s431_s1] ss:$0 sm:$0xff]  ;;  %v356_v1 = vld [vmem:[%s431_s1 + $0x1] ss:$0 sm:$0xff] }
   0xc   : > { %s302_s11 = sshll.u32 %s434_s10, 7 }
   0xd   : > { %s351_s16 = scalar_lea.vmem %s430_s0, %s302_s11  ;;  %s379_s21 = scalar_lea.vmem %s432_s2, %s302_s11 }
   0xe   : > { %v144_v2 = vld [vmem:[%s351_s16] sm:$0xff]  ;;  %v145_v3 = vld [vmem:[%s351_s16 + $0x8] sm:$0xff]  ;;  %v146_v4 = vld [vmem:[%s351_s16 + $0x10] sm:$0xff] }
   0xf   : > { %v166_v5 = vmul.f32 %v346_v0, %v144_v2  ;;  %v167_v6 = vmul.f32 %v346_v0, %v145_v3  ;;  %v168_v7 = vmul.f32 %v346_v0, %v146_v4  ;;  %v147_v8 = vld [vmem:[%s351_s16 + $0x18] sm:$0xff]  ;;  %v148_v9 = vld [vmem:[%s351_s16 + $0x20] sm:$0xff]  ;;  %v149_v10 = vld [vmem:[%s351_s16 + $0x28] sm:$0xff] }
  0x10   : > { %v169_v11 = vmul.f32 %v346_v0, %v147_v8  ;;  %v170_v12 = vmul.f32 %v346_v0, %v148_v9  ;;  %v171_v13 = vmul.f32 %v346_v0, %v149_v10  ;;  %v150_v14 = vld [vmem:[%s351_s16 + $0x30] sm:$0xff]  ;;  %v151_v15 = vld [vmem:[%s351_s16 + $0x38] sm:$0xff]  ;;  %v152_v24 = vld [vmem:[%s351_s16 + $0x40] sm:$0xff] }
  0x11   : > { %v186_v16 = vadd.f32 %v356_v1, %v166_v5  ;;  %v187_v17 = vadd.f32 %v356_v1, %v167_v6  ;;  %v188_v18 = vadd.f32 %v356_v1, %v168_v7  ;;  %v172_v19 = vmul.f32 %v346_v0, %v150_v14  ;;  %v153_v25 = vld [vmem:[%s351_s16 + $0x48] sm:$0xff]  ;;  %v154_v26 = vld [vmem:[%s351_s16 + $0x50] sm:$0xff]  ;;  %v155_v31 = vld [vmem:[%s351_s16 + $0x58] sm:$0xff] }
  0x12   : > { %v189_v20 = vadd.f32 %v356_v1, %v169_v11  ;;  %v190_v21 = vadd.f32 %v356_v1, %v170_v12  ;;  %v191_v22 = vadd.f32 %v356_v1, %v171_v13  ;;  %v173_v23 = vmul.f32 %v346_v0, %v151_v15  ;;  %v156_v32 = vld [vmem:[%s351_s16 + $0x60] sm:$0xff]  ;;  %v157_v33 = vld [vmem:[%s351_s16 + $0x68] sm:$0xff]  ;;  %v158_v38 = vld [vmem:[%s351_s16 + $0x70] sm:$0xff] }
  0x13   : > { %v202_v27 = vmax.f32 %v186_v16, 0.0  ;;  %v203_v28 = vmax.f32 %v187_v17, 0.0  ;;  %v204_v29 = vmax.f32 %v188_v18, 0.0  ;;  %v192_v30 = vadd.f32 %v356_v1, %v172_v19  ;;  %v159_v43 = vld [vmem:[%s351_s16 + $0x78] sm:$0xff] }
  0x14   : > { %v205_v34 = vmax.f32 %v189_v20, 0.0  ;;  %v206_v35 = vmax.f32 %v190_v21, 0.0  ;;  %v207_v36 = vmax.f32 %v191_v22, 0.0  ;;  %v193_v37 = vadd.f32 %v356_v1, %v173_v23 }
  0x15   : > { %218 = vst [vmem:[%s379_s21] sm:$0xff] %v202_v27  ;;  %219 = vst [vmem:[%s379_s21 + $0x8] sm:$0xff] %v203_v28  ;;  %v208_v39 = vmax.f32 %v192_v30, 0.0  ;;  %v174_v40 = vmul.f32 %v346_v0, %v152_v24  ;;  %v175_v41 = vmul.f32 %v346_v0, %v153_v25  ;;  %v176_v42 = vmul.f32 %v346_v0, %v154_v26 }
  0x16   : > { %220 = vst [vmem:[%s379_s21 + $0x10] sm:$0xff] %v204_v29  ;;  %221 = vst [vmem:[%s379_s21 + $0x18] sm:$0xff] %v205_v34  ;;  %v209_v44 = vmax.f32 %v193_v37, 0.0  ;;  %v177_v45 = vmul.f32 %v346_v0, %v155_v31  ;;  %v178_v46 = vmul.f32 %v346_v0, %v156_v32  ;;  %v179_v47 = vmul.f32 %v346_v0, %v157_v33 }
  0x17   : > { %222 = vst [vmem:[%s379_s21 + $0x20] sm:$0xff] %v206_v35  ;;  %223 = vst [vmem:[%s379_s21 + $0x28] sm:$0xff] %v207_v36  ;;  %v194_v48 = vadd.f32 %v356_v1, %v174_v40  ;;  %v195_v49 = vadd.f32 %v356_v1, %v175_v41  ;;  %v196_v50 = vadd.f32 %v356_v1, %v176_v42 }
  0x18   : > { %224 = vst [vmem:[%s379_s21 + $0x30] sm:$0xff] %v208_v39  ;;  %v180_v51 = vmul.f32 %v346_v0, %v158_v38  ;;  %225 = vst [vmem:[%s379_s21 + $0x38] sm:$0xff] %v209_v44  ;;  %v197_v52 = vadd.f32 %v356_v1, %v177_v45  ;;  %v198_v53 = vadd.f32 %v356_v1, %v178_v46 }
  0x19   : > { %v199_v54 = vadd.f32 %v356_v1, %v179_v47  ;;  %v181_v55 = vmul.f32 %v346_v0, %v159_v43  ;;  %v210_v56 = vmax.f32 %v194_v48, 0.0  ;;  %v211_v57 = vmax.f32 %v195_v49, 0.0 }
  0x1a   : > { %v212_v58 = vmax.f32 %v196_v50, 0.0  ;;  %v200_v59 = vadd.f32 %v356_v1, %v180_v51  ;;  %v213_v60 = vmax.f32 %v197_v52, 0.0  ;;  %v214_v61 = vmax.f32 %v198_v53, 0.0 }
  0x1b   : > { %v215_v62 = vmax.f32 %v199_v54, 0.0  ;;  %v201_v63 = vadd.f32 %v356_v1, %v181_v55  ;;  %226 = vst [vmem:[%s379_s21 + $0x40] sm:$0xff] %v210_v56  ;;  %227 = vst [vmem:[%s379_s21 + $0x48] sm:$0xff] %v211_v57 }
  0x1c   : > { %228 = vst [vmem:[%s379_s21 + $0x50] sm:$0xff] %v212_v58  ;;  %v216_v2 = vmax.f32 %v200_v59, 0.0  ;;  %229 = vst [vmem:[%s379_s21 + $0x58] sm:$0xff] %v213_v60 }
  0x1d   : > { %230 = vst [vmem:[%s379_s21 + $0x60] sm:$0xff] %v214_v61  ;;  %231 = vst [vmem:[%s379_s21 + $0x68] sm:$0xff] %v215_v62  ;;  %v217_v0 = vmax.f32 %v201_v63, 0.0 }
  0x1e   : > { %232 = vst [vmem:[%s379_s21 + $0x70] sm:$0xff] %v216_v2 }
  0x1f   : > { %233 = vst [vmem:[%s379_s21 + $0x78] sm:$0xff] %v217_v0 }
  0x20 PF: > { %s12_s9 = sadd.s32 1, %s318_s9  }
  0x21   : > { %p9_p4 = scmp.ge.s32.totalorder %s12_s9, 6  }
  0x23   :  { %11 = sbr.rel (!%p9_p4) target bundleno = 1 (0x1), region = 58 }

// kernel: conv_block1_forward.4
= control target key start
LH: loop header
LB: loop body
LE: loop exit
PB: predicated region body
PF: predicated region fallthrough
CT: control target
= control target key end

     0   :  { %s4180_s12 = smov 0   ;;  %s5205_s0 = inlined_call_operand.vmem [shape: bf16[4,10,18,128], index: 0, kind: input, shape index: {}]   ;;  %s5206_s1 = inlined_call_operand.vmem [shape: bf16[9,128,128], index: 1, kind: input, shape index: {}]   ;;  %s5207_s2 = inlined_call_operand.vmem [shape: f32[4,8,16,128], index: 2, kind: output, shape index: {0}]   ;;  %s5208_s3 = inlined_call_operand.vmem [shape: f32[4,2,128], index: 3, kind: output, shape index: {1}]  }
   0x1 LB: > { %s3195_s13 = sadd.s32 4294967295, %s4158_s12   ;;  %p3199_p0 = scmp.ge.s32.totalorder %s4158_s12, 1  ;;  %s4158_s12 = sphi %s4180_s12, %s14_s12  }
   0x2   : > { %p140_p1 = scmp.lt.s32.totalorder %s4158_s12, 5 }
   0x4   : > { %p141_p2 = pnand %p3199_p0, %p140_p1 }
   0x6   : > { %144 = sbr.rel (%p141_p2) target bundleno = 425 (0x1a9), region = 28 }
   0xb   : > { %v4056_v0 = vld [vmem:[%s5206_s1 + $0x78] sm:$0xff]   ;;  %p168_p3 = scmp.lt.s32.totalorder %s3195_s13, 3  ;;  %v4058_v2 = vld [vmem:[%s5206_s1 + $0x70] sm:$0xff]   ;;  %v4060_v4 = vld [vmem:[%s5206_s1 + $0x68] sm:$0xff]   ;;  %vm223_vm0 = vsmask.f32 3328 }
   0xc   : > { %v4057_v1 = vld [vmem:[%s5206_s1 + $0x38] sm:$0xff]   ;;  %3743 = vmatprep.subr.bf16.mxu0 %v4056_v0  ;;  %v4059_v3 = vld [vmem:[%s5206_s1 + $0x30] sm:$0xff]   ;;  %v4061_v5 = vld [vmem:[%s5206_s1 + $0x28] sm:$0xff]   ;;  %vm224_vm1 = vsmask.f32 7440  ;;  %vm829_vm3 = vcmask 1042432  }
   0xd   : > { %3775 = vmatprep.subr.bf16.mxu1 %v4057_v1  ;;  %3744 = vmatpush3.bf16.msra.mxu0 %v4056_v0  ;;  %s5246_s13 = smov (!%p168_p3, %s3195_s13), 3  ;;  %v4062_v6 = vld [vmem:[%s5206_s1 + $0x60] sm:$0xff]   ;;  %v4064_v8 = vld [vmem:[%s5206_s1 + $0x58] sm:$0xff]   ;;  %v4066_v10 = vld [vmem:[%s5206_s1 + $0x50] sm:$0xff]   ;;  %vm830_vm4 = vcmask 1046532   ;;  %vm3106_vm6 = vcmask 1040384  }
   0xe   : > { %3776 = vmatpush3.bf16.msra.mxu1 %v4057_v1  ;;  %3745 = vmatprep.subr.bf16.mxu0 %v4058_v2  ;;  %v4063_v7 = vld [vmem:[%s5206_s1 + $0x20] sm:$0xff]   ;;  %s4047_s30 = smul.u32 120, %s5246_s13  ;;  %v4065_v9 = vld [vmem:[%s5206_s1 + $0x18] sm:$0xff]   ;;  %v4067_v11 = vld [vmem:[%s5206_s1 + $0x10] sm:$0xff]   ;;  %s3203_s20 = sshll.u32 %s5246_s13, 1 }
   0xf   : > { %3777 = vmatprep.subr.bf16.mxu1 %v4059_v3  ;;  %v4068_v26 = vld [vmem:[%s5206_s1 + $0x48] sm:$0xff]   ;;  %v4070_v35 = vld [vmem:[%s5206_s1 + $0x40] sm:$0xff]   ;;  %vm4267_vm2 = vmor %vm223_vm0, %vm224_vm1  ;;  %s181_s23 = scalar_lea.vmem %s5208_s3, %s3203_s20 }
  0x10   : > { %s4224_s10 = scalar_lea.vmem %s5205_s0, %s4047_s30  ;;  %v4069_v30 = vld [vmem:[%s5206_s1 + $0x8] sm:$0xff]   ;;  %v4071_v47 = vld [vmem:[%s5206_s1] sm:$0xff]   ;;  %v4074_v55 = vld [vmem:[%s5206_s1 + $0xb8] sm:$0xff]  }
  0x11   : > { %3746 = vmatpush3.bf16.msra.mxu0 %v4058_v2  ;;  %v183_v12 = vld [vmem:[%s4224_s10] sm:$0xf]  ;;  %v4234_v13 = vld [vmem:[%s4224_s10 + $0x4] sm:$0xf]  ;;  %v4237_v14 = vld [vmem:[%s4224_s10 + $0x8] sm:$0x1] }
  0x12   : > { %3778 = vmatpush3.bf16.msra.mxu1 %v4059_v3  ;;  %3747 = vmatprep.subr.bf16.mxu0 %v4060_v4  ;;  %v227_v15 = vshrl.u32 %v183_v12, 16  ;;  %v230_v16 = vshll.u32 %v183_v12, 16  ;;  %v236_v17 = vshll.u32 %v4234_v13, 16  ;;  %v240_v18 = vshrl.u32 %v4234_v13, 16  ;;  %v4243_v20 = vld [vmem:[%s4224_s10 + $0xc] sm:$0xf]  ;;  %vm4440_vm5 = vmor %vm829_vm3, %vm830_vm4 }
  0x13   : > { %3779 = vmatprep.subr.bf16.mxu1 %v4061_v5  ;;  %v246_v19 = vshll.u32 %v4237_v14, 16  ;;  %v3236_v23 = vcombine.low %v183_v12, %v4234_v13  ;;  %v4247_v24 = vld [vmem:[%s4224_s10 + $0x10] sm:$0xf]  ;;  %v4250_v25 = vld [vmem:[%s4224_s10 + $0x14] sm:$0x1]  ;;  %v251_v29 = vshrl.u32 %v4243_v20, 16 }
  0x14   : > { %v229_v21 = vrot.slane %v227_v15, 4  ;;  %v232_v22 = vrot.slane %v230_v16, 5  ;;  %v238_v27 = vrot.slane %v236_v17, 5  ;;  %v242_v28 = vrot.slane %v240_v18, 4  ;;  %v4287_v56 = vld [vmem:[%s4224_s10 + $0x18] sm:$0xf] }
  0x15   : > { %3748 = vmatpush3.bf16.msra.mxu0 %v4060_v4  ;;  %3791 = vmatprep.mubr.bf16.mxu1 %v3236_v23  ;;  %v254_v32 = vshll.u32 %v4243_v20, 16  ;;  %v260_v33 = vshll.u32 %v4247_v24, 16  ;;  %v264_v34 = vshrl.u32 %v4247_v24, 16  ;;  %v248_v38 = vrot.slane %v246_v19, 5  ;;  %v4290_v57 = vld [vmem:[%s4224_s10 + $0x1c] sm:$0xf] }
  0x16   : > { %3780 = vmatpush3.bf16.msra.mxu1 %v4061_v5  ;;  %3749 = vmatprep.subr.bf16.mxu0 %v4062_v6  ;;  %v233_v31 = vor.u32 %v232_v22, %v229_v21  ;;  %v243_v37 = vor.u32 %v242_v28, %v238_v27  ;;  %v253_v39 = vrot.slane %v251_v29, 4  ;;  %v270_v40 = vshll.u32 %v4250_v25, 16  ;;  %v4075_v61 = vld [vmem:[%s5206_s1 + $0xf8] sm:$0xff]   ;;  %v4296_v62 = vld [vmem:[%s4224_s10 + $0x20] sm:$0x1]  ;;  %v4076_v12 = vld [vmem:[%s5206_s1 + $0xb0] sm:$0xff]  }
  0x17   : > { %3781 = vmatprep.subr.bf16.mxu1 %v4063_v7  ;;  %v256_v42 = vrot.slane %v254_v32, 5  ;;  %v262_v43 = vrot.slane %v260_v33, 5  ;;  %v266_v44 = vrot.slane %v264_v34, 4  ;;  %v837_v46 = vrot.slane %v4237_v14, 5  ;;  %v4304_v4 = vld [vmem:[%s4224_s10 + $0x24] sm:$0xf] }
  0x18   : > { %v234_v41 = vrot.slane %v233_v31, 4  ;;  %v244_v45 = vrot.slane %v243_v37, 4  ;;  %v272_v51 = vrot.slane %v270_v40, 5  ;;  %v844_v53 = vrot.slane %v4250_v25, 5  ;;  %v4077_v28 = vld [vmem:[%s5206_s1 + $0xf0] sm:$0xff]  }
  0x19   : > { %3750 = vmatpush3.bf16.msra.mxu0 %v4062_v6  ;;  %v257_v49 = vor.u32 %v256_v42, %v253_v39  ;;  %v267_v50 = vor.u32 %v266_v44, %v262_v43  ;;  %v3237_v54 = vcombine.low %v4243_v20, %v4247_v24  ;;  %v275_v63 = vshrl.u32 %v4287_v56, 16  ;;  %v4333_v40 = vld [vmem:[%s4224_s10 + $0x30] sm:$0xf]  ;;  %v4080_v44 = vld [vmem:[%s5206_s1 + $0xa8] sm:$0xff]  }
  0x1a   : > { %3782 = vmatpush3.bf16.msra.mxu1 %v4063_v7  ;;  %3751 = vmatprep.subr.bf16.mxu0 %v4064_v8  ;;  %v239_v48 = vsel %vm4267_vm2, %v234_v41, %v238_v27  ;;  %v249_v52 = vsel %vm4267_vm2, %v244_v45, %v248_v38  ;;  %v278_v0 = vshll.u32 %v4287_v56, 16  ;;  %v284_v1 = vshll.u32 %v4290_v57, 16  ;;  %v4343_v45 = vld [vmem:[%s4224_s10 + $0x34] sm:$0xf] }
  0x1b   : > { %3783 = vmatprep.subr.bf16.mxu1 %v4065_v9  ;;  %v3220_v58 = vcombine.low %v239_v48, %v249_v52  ;;  %v258_v59 = vrot.slane %v257_v49, 4  ;;  %v268_v60 = vrot.slane %v267_v50, 4  ;;  %v288_v2 = vshrl.u32 %v4290_v57, 16 }
  0x1c   : > { %v294_v3 = vshll.u32 %v4296_v62, 16  ;;  %v277_v7 = vrot.slane %v275_v63, 4  ;;  %v280_v15 = vrot.slane %v278_v0, 5  ;;  %v286_v16 = vrot.slane %v284_v1, 5  ;;  %v4082_v0 = vld [vmem:[%s5206_s1 + $0xa0] sm:$0xff]  }
  0x1d   : > { %3752 = vmatpush3.bf16.msra.mxu0 %v4064_v8  ;;  %3759 = vmatprep.mubr.bf16.mxu0 %v3220_v58  ;;  %v263_v5 = vsel %vm4267_vm2, %v258_v59, %v262_v43  ;;  %v273_v6 = vsel %vm4267_vm2, %v268_v60, %v272_v51  ;;  %v4311_v8 = vld [vmem:[%s4224_s10 + $0x28] sm:$0xf]  ;;  %v290_v17 = vrot.slane %v288_v2, 4  ;;  %v299_v19 = vshrl.u32 %v4304_v4, 16 }
  0x1e   : > { %3784 = vmatpush3.bf16.msra.mxu1 %v4065_v9  ;;  %3753 = vmatprep.subr.bf16.mxu0 %v4066_v10  ;;  %v4314_v9 = vld [vmem:[%s4224_s10 + $0x2c] sm:$0x1]  ;;  %v296_v18 = vrot.slane %v294_v3, 5  ;;  %v302_v20 = vshll.u32 %v4304_v4, 16  ;;  %v308_v21 = vshll.u32 %v4311_v8, 16  ;;  %v281_v22 = vor.u32 %v280_v15, %v277_v7 }
  0x1f   : > { %3785 = vmatprep.subr.bf16.mxu1 %v4067_v11  ;;  %v291_v23 = vor.u32 %v290_v17, %v286_v16  ;;  %v318_v27 = vshll.u32 %v4314_v9, 16  ;;  %v3238_v29 = vcombine.low %v4287_v56, %v4290_v57  ;;  %v3239_v39 = vcombine.low %v4304_v4, %v4311_v8  ;;  %v4081_v51 = vld [vmem:[%s5206_s1 + $0xe8] sm:$0xff]   ;;  %v4370_v4 = vld [vmem:[%s4224_s10 + $0x44] sm:$0x1] }
  0x20   : > { %v304_v31 = vrot.slane %v302_v20, 5  ;;  %v310_v32 = vrot.slane %v308_v21, 5  ;;  %v282_v33 = vrot.slane %v281_v22, 4  ;;  %v323_v48 = vshrl.u32 %v4333_v40, 16 }
  0x21   : > { %3754 = vmatpush3.bf16.msra.mxu0 %v4066_v10  ;;  %v834_v10 = vrot.slane %v4234_v13, 5  ;;  %v292_v34 = vrot.slane %v291_v23, 4  ;;  %v320_v37 = vrot.slane %v318_v27, 5  ;;  %v326_v52 = vshll.u32 %v4333_v40, 16 }
  0x22   : > { %3786 = vmatpush3.bf16.msra.mxu1 %v4067_v11  ;;  %3755 = vmatprep.subr.bf16.mxu0 %v4068_v26  ;;  %v3221_v11 = vcombine.low %v263_v5, %v273_v6  ;;  %v287_v41 = vsel %vm4267_vm2, %v282_v33, %v286_v16  ;;  %v325_v58 = vrot.slane %v323_v48, 4  ;;  %v336_v59 = vshrl.u32 %v4343_v45, 16  ;;  %v4083_v6 = vld [vmem:[%s5206_s1 + $0xe0] sm:$0xff]  }
  0x23   : > { %3787 = vmatprep.subr.bf16.mxu1 %v4069_v30  ;;  %v297_v42 = vsel %vm4267_vm2, %v292_v34, %v296_v18  ;;  %v328_v1 = vrot.slane %v326_v52, 5  ;;  %v3240_v3 = vcombine.low %v4333_v40, %v4343_v45  ;;  %v366_v22 = vshll.u32 %v4370_v4, 16 }
  0x24   : > { %v3222_v49 = vcombine.low %v287_v41, %v297_v42  ;;  %v338_v7 = vrot.slane %v336_v59, 4  ;;  %v4399_v41 = vld [vmem:[%s4224_s10 + $0x50] sm:$0x1]  ;;  %v862_v25 = vrot.slane %v4343_v45, 5 }
  0x25   : > { %3756 = vmatpush3.bf16.msra.mxu0 %v4068_v26  ;;  %v312_v26 = vshrl.u32 %v4311_v8, 16  ;;  %v329_v16 = vor.u32 %v328_v1, %v325_v58 }
  0x26   : > { %3788 = vmatpush3.bf16.msra.mxu1 %v4069_v30  ;;  %3757 = vmatprep.subr.bf16.mxu0 %v4070_v35  ;;  %v301_v30 = vrot.slane %v299_v19, 4 }
  0x27   : > { %3789 = vmatprep.subr.bf16.mxu1 %v4071_v47  ;;  %v330_v23 = vrot.slane %v329_v16, 4 }
  0x28   : > { %v305_v38 = vor.u32 %v304_v31, %v301_v30  ;;  %v368_v31 = vrot.slane %v366_v22, 5 }
  0x29   : > { %3758 = vmatpush3.bf16.msra.mxu0 %v4070_v35  ;;  %v314_v35 = vrot.slane %v312_v26, 4 }
  0x2a   : > { %3790 = vmatpush3.bf16.msra.mxu1 %v4071_v47  ;;  %3807 = vmatprep.subr.bf16.mxu0 %v4074_v55  ;;  %v4346_v47 = vld [vmem:[%s4224_s10 + $0x38] sm:$0x1]  ;;  %v306_v50 = vrot.slane %v305_v38, 4  ;;  %v4394_v38 = vld [vmem:[%s4224_s10 + $0x4c] sm:$0xf] }
  0x2b   : > { %3839 = vmatprep.subr.bf16.mxu1 %v4075_v61  ;;  %v315_v43 = vor.u32 %v314_v35, %v310_v32  ;;  %v342_v60 = vshll.u32 %v4346_v47, 16  ;;  %v384_v52 = vshrl.u32 %v4394_v38, 16 }
  0x2c   : > { %3760 = vmatmul.mubr.bf16.vlgmr.msra.gmra.mxu0 %v3221_v11  ;;  %v311_v63 = vsel %vm4267_vm2, %v306_v50, %v310_v32  ;;  %v4087_v32 = vld [vmem:[%s5206_s1 + $0xd8] sm:$0xff]   ;;  %v4088_v50 = vld [vmem:[%s5206_s1 + $0x90] sm:$0xff]  }
  0x2d   : > { %3792 = vmatmul.mubr.bf16.vlgmr.msra.gmra.mxu1 %v3237_v54  ;;  %3808 = vmatpush3.bf16.msra.mxu0 %v4074_v55  ;;  %v332_v54 = vshll.u32 %v4343_v45, 16  ;;  %v4355_v55 = vld [vmem:[%s4224_s10 + $0x3c] sm:$0xf]  ;;  %v316_v56 = vrot.slane %v315_v43, 4  ;;  %v344_v11 = vrot.slane %v342_v60, 5  ;;  %v390_v60 = vshll.u32 %v4399_v41, 16 }
  0x2e   : > { %3840 = vmatpush3.bf16.msra.mxu1 %v4075_v61  ;;  %3809 = vmatprep.subr.bf16.mxu0 %v4076_v12  ;;  %v4360_v61 = vld [vmem:[%s4224_s10 + $0x40] sm:$0xf]  ;;  %v350_v17 = vshll.u32 %v4355_v55, 16 }
  0x2f   : > { %3841 = vmatprep.subr.bf16.mxu1 %v4077_v28  ;;  %3795 = vmatprep.mubr.bf16.mxu1 %v3238_v29  ;;  %v334_v2 = vrot.slane %v332_v54, 5  ;;  %v321_v5 = vsel %vm4267_vm2, %v316_v56, %v320_v37  ;;  %v356_v18 = vshll.u32 %v4360_v61, 16  ;;  %v360_v21 = vshrl.u32 %v4360_v61, 16  ;;  %v195_v37 = vld [vmem:[%s4224_s10 + $0x48] sm:$0xf]  ;;  %v4089_v56 = vld [vmem:[%s5206_s1 + $0xd0] sm:$0xff]  }
  0x30   : > { %3763 = vmatprep.mubr.bf16.mxu0 %v3222_v49  ;;  %v3223_v15 = vcombine.low %v311_v63, %v321_v5  ;;  %v352_v26 = vrot.slane %v350_v17, 5  ;;  %v3241_v35 = vcombine.low %v4355_v55, %v4360_v61  ;;  %v371_v42 = vshrl.u32 %v195_v37, 16  ;;  %v4410_v54 = vld [vmem:[%s4224_s10 + $0x58] sm:$0xf]  ;;  %v4417_v63 = vld [vmem:[%s4224_s10 + $0x5c] sm:$0x1] }
  0x31   : > { %3810 = vmatpush3.bf16.msra.mxu0 %v4076_v12  ;;  %v347_v12 = vshrl.u32 %v4355_v55, 16  ;;  %v339_v19 = vor.u32 %v338_v7, %v334_v2  ;;  %v358_v27 = vrot.slane %v356_v18, 5  ;;  %v362_v30 = vrot.slane %v360_v21, 4  ;;  %v4092_v18 = vld [vmem:[%s5206_s1 + $0x88] sm:$0xff]  }
  0x32   : > { %3842 = vmatpush3.bf16.msra.mxu1 %v4077_v28  ;;  %3811 = vmatprep.subr.bf16.mxu0 %v4080_v44  ;;  %v4086_v28 = vld [vmem:[%s5206_s1 + $0x98] sm:$0xff]   ;;  %v335_v33 = vsel %vm4267_vm2, %v330_v23, %v334_v2  ;;  %v374_v43 = vshll.u32 %v195_v37, 16  ;;  %v373_v58 = vrot.slane %v371_v42, 4  ;;  %v392_v7 = vrot.slane %v390_v60, 5 }
  0x33   : > { %3843 = vmatprep.subr.bf16.mxu1 %v4081_v51  ;;  %v349_v20 = vrot.slane %v347_v12, 4  ;;  %v340_v29 = vrot.slane %v339_v19, 4  ;;  %v363_v40 = vor.u32 %v362_v30, %v358_v27  ;;  %v404_v17 = vshll.u32 %v4410_v54, 16 }
  0x34   : > { %3764 = vmatmul.mubr.bf16.gmra.mxu0 %v3223_v15  ;;  %v376_v59 = vrot.slane %v374_v43, 5  ;;  %v408_v21 = vshrl.u32 %v4410_v54, 16  ;;  %v414_v22 = vshll.u32 %v4417_v63, 16  ;;  %v869_v45 = vrot.slane %v4360_v61, 5 }
  0x35   : > { %3796 = vmatmul.mubr.bf16.gmra.mxu1 %v3239_v39  ;;  %3812 = vmatpush3.bf16.msra.mxu0 %v4080_v44  ;;  %v353_v34 = vor.u32 %v352_v26, %v349_v20  ;;  %v345_v39 = vsel %vm4267_vm2, %v340_v29, %v344_v11  ;;  %v4402_v44 = vld [vmem:[%s4224_s10 + $0x54] sm:$0xf]  ;;  %v364_v55 = vrot.slane %v363_v40, 4  ;;  %v4093_v29 = vld [vmem:[%s5206_s1 + $0xc8] sm:$0xff]   ;;  %v4094_v40 = vld [vmem:[%s5206_s1 + $0x80] sm:$0xff]  }
  0x36   : > { %3844 = vmatpush3.bf16.msra.mxu1 %v4081_v51  ;;  %3813 = vmatprep.subr.bf16.mxu0 %v4082_v0  ;;  %v3224_v48 = vcombine.low %v335_v33, %v345_v39  ;;  %v380_v51 = vshll.u32 %v4394_v38, 16  ;;  %v395_v11 = vshrl.u32 %v4402_v44, 16  ;;  %v398_v16 = vshll.u32 %v4402_v44, 16 }
  0x37   : > { %3845 = vmatprep.subr.bf16.mxu1 %v4083_v6  ;;  %3799 = vmatprep.mubr.bf16.mxu1 %v3240_v3  ;;  %v354_v49 = vrot.slane %v353_v34, 4  ;;  %v386_v3 = vrot.slane %v384_v52, 4  ;;  %v369_v5 = vsel %vm4267_vm2, %v364_v55, %v368_v31  ;;  %v410_v30 = vrot.slane %v408_v21, 4  ;;  %v805_v31 = vld [vmem:[%s4224_s10] sm:$0xe]  ;;  %v4096_v52 = vld [vmem:[%s4224_s10 + $0xc] sm:$0xff]  }
  0x38   : > { %3767 = vmatprep.mubr.bf16.mxu0 %v3224_v48  ;;  %v382_v2 = vrot.slane %v380_v51, 5  ;;  %v397_v20 = vrot.slane %v395_v11, 4  ;;  %v400_v26 = vrot.slane %v398_v16, 5  ;;  %v836_v33 = vrot.slane %v834_v10, 4  ;;  %v806_v55 = vld [vmem:[%s4224_s10 + $0xc] sm:$0xe] }
  0x39   : > { %3814 = vmatpush3.bf16.msra.mxu0 %v4082_v0  ;;  %v359_v1 = vsel %vm4267_vm2, %v354_v49, %v358_v27  ;;  %v3242_v0 = vcombine.low %v195_v37, %v4394_v38  ;;  %v406_v27 = vrot.slane %v404_v17, 5  ;;  %v841_v34 = vrot.slane %v4247_v24, 5  ;;  %v4095_v24 = vld [vmem:[%s5206_s1 + $0xc0] sm:$0xff]  }
  0x3a   : > { %3846 = vmatpush3.bf16.msra.mxu1 %v4083_v6  ;;  %3815 = vmatprep.subr.bf16.mxu0 %v4086_v28  ;;  %v377_v6 = vor.u32 %v376_v59, %v373_v58  ;;  %v3225_v12 = vcombine.low %v359_v1, %v369_v5  ;;  %v387_v15 = vor.u32 %v386_v3, %v382_v2  ;;  %v3252_v42 = vrot.slane %v805_v31, 9  ;;  %v4099_v3 = vld [vmem:[%s5206_s1 + $0x178] sm:$0xff]   ;;  %v4107_v31 = vld [vmem:[%s5206_s1 + $0x160] sm:$0xff]  }
  0x3b   : > { %3847 = vmatprep.subr.bf16.mxu1 %v4087_v32  ;;  %v401_v37 = vor.u32 %v400_v26, %v397_v20  ;;  %v3243_v39 = vcombine.low %v4402_v44, %v4410_v54  ;;  %v411_v48 = vor.u32 %v410_v30, %v406_v27  ;;  %v416_v49 = vrot.slane %v414_v22, 5  ;;  %v809_v22 = vld [vmem:[%s4224_s10 + $0x30] sm:$0xe]  ;;  %v4104_v30 = vld [vmem:[%s5206_s1 + $0x128] sm:$0xff]  }
  0x3c   : > { %v378_v19 = vrot.slane %v377_v6, 4  ;;  %3768 = vmatmul.mubr.bf16.gmra.mxu0 %v3225_v12  ;;  %v388_v23 = vrot.slane %v387_v15, 4  ;;  %v843_v58 = vrot.slane %v841_v34, 4  ;;  %v3253_v13 = vrot.slane %v806_v55, 9  ;;  %v4097_v6 = vld [vmem:[%s4224_s10 + $0x18] sm:$0xff]   ;;  %v4102_v15 = vld [vmem:[%s4224_s10 + $0x24] sm:$0xff]  }
  0x3d   : > { %3800 = vmatmul.mubr.bf16.gmra.mxu1 %v3241_v35  ;;  %3816 = vmatpush3.bf16.msra.mxu0 %v4086_v28  ;;  %v402_v51 = vrot.slane %v401_v37, 4  ;;  %v412_v44 = vrot.slane %v411_v48, 4  ;;  %v848_v1 = vrot.slane %v4290_v57, 5  ;;  %v851_v57 = vrot.slane %v4296_v62, 5  ;;  %v808_v62 = vld [vmem:[%s4224_s10 + $0x24] sm:$0xe] }
  0x3e   : > { %3848 = vmatpush3.bf16.msra.mxu1 %v4087_v32  ;;  %3817 = vmatprep.subr.bf16.mxu0 %v4088_v50  ;;  %v383_v28 = vsel %vm4267_vm2, %v378_v19, %v382_v2  ;;  %v393_v35 = vsel %vm4267_vm2, %v388_v23, %v392_v7  ;;  %v807_v2 = vld [vmem:[%s4224_s10 + $0x18] sm:$0xe]  ;;  %v4101_v7 = vld [vmem:[%s5206_s1 + $0x170] sm:$0xff]   ;;  %v842_v11 = vsel %vm4440_vm5, %v3253_v13, %v841_v34  ;;  %v855_v16 = vrot.slane %v4311_v8, 5 }
  0x3f   : > { %3849 = vmatprep.subr.bf16.mxu1 %v4089_v56  ;;  %3803 = vmatprep.mubr.bf16.mxu1 %v3242_v0  ;;  %v3226_v43 = vcombine.low %v383_v28, %v393_v35  ;;  %v407_v59 = vsel %vm4267_vm2, %v402_v51, %v406_v27  ;;  %v417_v60 = vsel %vm4267_vm2, %v412_v44, %v416_v49  ;;  %v3254_v0 = vrot.slane %v807_v2, 9  ;;  %v4103_v26 = vld [vmem:[%s4224_s10 + $0x30] sm:$0xff]   ;;  %v4105_v27 = vld [vmem:[%s5206_s1 + $0x168] sm:$0xff]  }
  0x40   : > { %v850_v5 = vrot.slane %v848_v1, 4  ;;  %v845_v12 = vsel %vm4440_vm5, %v843_v58, %v844_v53  ;;  %v4100_v53 = vld [vmem:[%s5206_s1 + $0x130] sm:$0xff]   ;;  %v858_v8 = vrot.slane %v4314_v9, 5  ;;  %v3255_v20 = vrot.slane %v808_v62, 9 }
  0x41   : > { %3818 = vmatpush3.bf16.msra.mxu0 %v4088_v50  ;;  %3771 = vmatprep.mubr.bf16.mxu0 %v3226_v43  ;;  %v835_v50 = vsel %vm4440_vm5, %v3252_v42, %v834_v10  ;;  %v3227_v10 = vcombine.low %v407_v59, %v417_v60  ;;  %v849_v17 = vsel %vm4440_vm5, %v3254_v0, %v848_v1  ;;  %v857_v21 = vrot.slane %v855_v16, 4  ;;  %v812_v44 = vld [vmem:[%s4224_s10 + $0x54] sm:$0xe]  ;;  %v4109_v60 = vld [vmem:[%s4224_s10 + $0x48] sm:$0xff]  }
  0x42   : > { %3850 = vmatpush3.bf16.msra.mxu1 %v4089_v56  ;;  %3819 = vmatprep.subr.bf16.mxu0 %v4092_v18  ;;  %v838_v56 = vsel %vm4440_vm5, %v836_v33, %v837_v46  ;;  %v4098_v46 = vld [vmem:[%s5206_s1 + $0x138] sm:$0xff]   ;;  %v3277_v19 = vcombine.low %v842_v11, %v845_v12  ;;  %v864_v28 = vrot.slane %v862_v25, 4  ;;  %v865_v9 = vrot.slane %v4346_v47, 5  ;;  %v3340_v0 = vld [vmem:[%s4224_s10 + $0xc] sm:$0xf] }
  0x43   : > { %3851 = vmatprep.subr.bf16.mxu1 %v4093_v29  ;;  %v3276_v14 = vcombine.low %v835_v50, %v838_v56  ;;  %v810_v33 = vld [vmem:[%s4224_s10 + $0x3c] sm:$0xe]  ;;  %v856_v61 = vsel %vm4440_vm5, %v3255_v20, %v855_v16  ;;  %v859_v34 = vsel %vm4440_vm5, %v857_v21, %v858_v8  ;;  %v876_v35 = vrot.slane %v4394_v38, 5  ;;  %v3342_v11 = vld [vmem:[%s4224_s10 + $0x14] sm:$0x1]  ;;  %v4117_v16 = vld [vmem:[%s5206_s1 + $0x148] sm:$0xff]  }
  0x44   : > { %3772 = vmatmul.mubr.bf16.gmra.mxu0 %v3227_v10  ;;  %v4108_v47 = vld [vmem:[%s4224_s10 + $0x3c] sm:$0xff]   ;;  %v871_v37 = vrot.slane %v869_v45, 4  ;;  %v866_v42 = vsel %vm4440_vm5, %v864_v28, %v865_v9  ;;  %v3257_v43 = vrot.slane %v810_v33, 9  ;;  %v879_v48 = vrot.slane %v4399_v41, 5  ;;  %v4116_v9 = vld [vmem:[%s5206_s1 + $0x108] sm:$0xff]  }
  0x45   : > { %3804 = vmatmul.mubr.bf16.gmra.mxu1 %v3243_v39  ;;  %3820 = vmatpush3.bf16.msra.mxu0 %v4092_v18  ;;  %v852_v18 = vsel %vm4440_vm5, %v850_v5, %v851_v57  ;;  %v872_v39 = vrot.slane %v4370_v4, 5  ;;  %v3279_v49 = vcombine.low %v856_v61, %v859_v34  ;;  %v878_v38 = vrot.slane %v876_v35, 4  ;;  %v4106_v4 = vld [vmem:[%s5206_s1 + $0x120] sm:$0xff]   ;;  %v4112_v5 = vld [vmem:[%s5206_s1 + $0x110] sm:$0xff]   ;;  %v3344_v28 = vld [vmem:[%s4224_s10 + $0x1c] sm:$0xf] }
  0x46   : > { %3852 = vmatpush3.bf16.msra.mxu1 %v4093_v29  ;;  %3821 = vmatprep.subr.bf16.mxu0 %v4094_v40  ;;  %v3278_v23 = vcombine.low %v849_v17, %v852_v18  ;;  %v3256_v29 = vrot.slane %v809_v22, 9  ;;  %v883_v51 = vrot.slane %v4410_v54, 5  ;;  %v886_v41 = vrot.slane %v4417_v63, 5  ;;  %v4111_v54 = vld [vmem:[%s5206_s1 + $0x158] sm:$0xff]   ;;  %v3345_v33 = vld [vmem:[%s4224_s10 + $0x20] sm:$0x1] }
  0x47   : > { %3853 = vmatprep.subr.bf16.mxu1 %v4095_v24  ;;  %3855 = vmatprep.mubr.bf16.mxu1 %v4096_v52  ;;  %v3259_v56 = vrot.slane %v812_v44, 9  ;;  %v870_v58 = vsel %vm4440_vm5, %v3257_v43, %v869_v45  ;;  %v873_v59 = vsel %vm4440_vm5, %v871_v37, %v872_v39  ;;  %v880_v13 = vsel %vm4440_vm5, %v878_v38, %v879_v48  ;;  %v4110_v63 = vld [vmem:[%s5206_s1 + $0x118] sm:$0xff]  }
  0x48   : > { %3823 = vmatprep.mubr.bf16.mxu0 %v3276_v14  ;;  %v885_v50 = vrot.slane %v883_v51, 4  ;;  %v3281_v2 = vcombine.low %v870_v58, %v873_v59  ;;  %v1366_v12 = vshrl.u32 %v3340_v0, 16  ;;  %v1385_v18 = vshll.u32 %v3342_v11, 16 }
  0x49   : > { %3822 = vmatpush3.bf16.msra.mxu0 %v4094_v40  ;;  %v863_v40 = vsel %vm4440_vm5, %v3256_v29, %v862_v25  ;;  %v4552_v10 = vsel %vm4440_vm5, %v3259_v56, %v883_v51  ;;  %v3396_v25 = vld [vmem:[%s4224_s10 + $0xc] sm:$0xe]  ;;  %v1804_v22 = vrot.slane %v3342_v11, 5  ;;  %v1399_v39 = vshll.u32 %v3344_v28, 16  ;;  %v3348_v11 = vld [vmem:[%s4224_s10 + $0x2c] sm:$0x1] }
  0x4a   : > { %3854 = vmatpush3.bf16.msra.mxu1 %v4095_v24  ;;  %3871 = vmatprep.subr.bf16.mxu0 %v4098_v46  ;;  %v811_v24 = vld [vmem:[%s4224_s10 + $0x48] sm:$0xe]  ;;  %v3280_v55 = vcombine.low %v863_v40, %v866_v42  ;;  %v4556_v14 = vsel %vm4440_vm5, %v885_v50, %v886_v41  ;;  %v1368_v8 = vrot.slane %v1366_v12, 4  ;;  %v3404_v21 = vrot.slane %v3396_v25, 9  ;;  %v4119_v42 = vld [vmem:[%s5206_s1 + $0x140] sm:$0xff]  }
  0x4b   : > { %3903 = vmatprep.subr.bf16.mxu1 %v4099_v3  ;;  %v3258_v52 = vrot.slane %v811_v24, 9  ;;  %v1403_v40 = vshrl.u32 %v3344_v28, 16  ;;  %v1401_v51 = vrot.slane %v1399_v39, 5  ;;  %v1808_v41 = vrot.slane %v3344_v28, 5 }
  0x4c   : > { %3824 = vmatmul.mubr.bf16.vlgmr.msra.gmra.mxu0 %v3277_v19  ;;  %v1811_v59 = vrot.slane %v3345_v33, 5 }
  0x4d   : > { %3856 = vmatmul.mubr.bf16.vlgmr.msra.gmra.mxu1 %v4097_v6  ;;  %3872 = vmatpush3.bf16.msra.mxu0 %v4098_v46  ;;  %v877_v1 = vsel %vm4440_vm5, %v3258_v52, %v876_v35  ;;  %v4113_v46 = vld [vmem:[%s5206_s1 + $0x150] sm:$0xff]   ;;  %v3283_v6 = vcombine.low %v4552_v10, %v4556_v14  ;;  %v1409_v52 = vshll.u32 %v3345_v33, 16  ;;  %v4120_v10 = vld [vmem:[%s5206_s1 + $0x1b8] sm:$0xff]  }
  0x4e   : > { %3904 = vmatpush3.bf16.msra.mxu1 %v4099_v3  ;;  %3859 = vmatprep.mubr.bf16.mxu1 %v4102_v15  ;;  %v4114_v3 = vld [vmem:[%s4224_s10 + $0x54] sm:$0xff]   ;;  %v3282_v57 = vcombine.low %v877_v1, %v880_v13  ;;  %v1369_v15 = vshll.u32 %v3340_v0, 16  ;;  %v3346_v0 = vld [vmem:[%s4224_s10 + $0x24] sm:$0xf]  ;;  %v3399_v33 = vld [vmem:[%s4224_s10 + $0x30] sm:$0xe] }
  0x4f   : > { %3905 = vmatprep.subr.bf16.mxu1 %v4101_v7  ;;  %3873 = vmatprep.subr.bf16.mxu0 %v4100_v53  ;;  %v1411_v58 = vrot.slane %v1409_v52, 5  ;;  %v1414_v12 = vshrl.u32 %v3346_v0, 16 }
  0x50   : > { %3827 = vmatprep.mubr.bf16.mxu0 %v3278_v23  ;;  %v1371_v20 = vrot.slane %v1369_v15, 5  ;;  %v3343_v23 = vld [vmem:[%s4224_s10 + $0x18] sm:$0xf]  ;;  %v1417_v15 = vshll.u32 %v3346_v0, 16 }
  0x51   : > { %3874 = vmatpush3.bf16.msra.mxu0 %v4100_v53  ;;  %v4115_v53 = vld [vmem:[%s4224_s10 + $0x60] sm:$0xff]   ;;  %v1390_v61 = vshrl.u32 %v3343_v23, 16  ;;  %v1393_v34 = vshll.u32 %v3343_v23, 16 }
  0x52   : > { %3906 = vmatpush3.bf16.msra.mxu1 %v4101_v7  ;;  %3875 = vmatprep.subr.bf16.mxu0 %v4104_v30  ;;  %v3341_v7 = vld [vmem:[%s4224_s10 + $0x10] sm:$0xf] }
  0x53   : > { %3907 = vmatprep.subr.bf16.mxu1 %v4105_v27  ;;  %v1375_v62 = vshll.u32 %v3341_v7, 16  ;;  %v1379_v17 = vshrl.u32 %v3341_v7, 16  ;;  %v1801_v19 = vrot.slane %v3341_v7, 5  ;;  %v1395_v24 = vrot.slane %v1393_v34, 5 }
  0x54   : > { %3828 = vmatmul.mubr.bf16.gmra.mxu0 %v3279_v49  ;;  %v1392_v49 = vrot.slane %v1390_v61, 4 }
  0x55   : > { %3860 = vmatmul.mubr.bf16.gmra.mxu1 %v4103_v26  ;;  %3876 = vmatpush3.bf16.msra.mxu0 %v4104_v30  ;;  %v1377_v26 = vrot.slane %v1375_v62, 5  ;;  %v1381_v45 = vrot.slane %v1379_v17, 4  ;;  %v1803_v29 = vrot.slane %v1801_v19, 4  ;;  %v1372_v30 = vor.u32 %v1371_v20, %v1368_v8 }
  0x56   : > { %3908 = vmatpush3.bf16.msra.mxu1 %v4105_v27  ;;  %3863 = vmatprep.mubr.bf16.mxu1 %v4108_v47  ;;  %v1387_v27 = vrot.slane %v1385_v18, 5  ;;  %v3397_v47 = vld [vmem:[%s4224_s10 + $0x18] sm:$0xe]  ;;  %v1396_v44 = vor.u32 %v1395_v24, %v1392_v49  ;;  %v3349_v18 = vld [vmem:[%s4224_s10 + $0x30] sm:$0xf]  ;;  %v1419_v8 = vrot.slane %v1417_v15, 5 }
  0x57   : > { %3909 = vmatprep.subr.bf16.mxu1 %v4107_v31  ;;  %3877 = vmatprep.subr.bf16.mxu0 %v4106_v4  ;;  %v1382_v35 = vor.u32 %v1381_v45, %v1377_v26  ;;  %v1805_v37 = vsel %vm4440_vm5, %v1803_v29, %v1804_v22  ;;  %v1373_v43 = vrot.slane %v1372_v30, 4  ;;  %v3405_v50 = vrot.slane %v3397_v47, 9  ;;  %v4122_v29 = vld [vmem:[%s5206_s1 + $0x1b0] sm:$0xff]  }
  0x58   : > { %3831 = vmatprep.mubr.bf16.mxu0 %v3280_v55  ;;  %v1433_v20 = vshll.u32 %v3348_v11, 16  ;;  %v1818_v30 = vrot.slane %v3348_v11, 5 }
  0x59   : > { %3878 = vmatpush3.bf16.msra.mxu0 %v4106_v4  ;;  %v1383_v38 = vrot.slane %v1382_v35, 4  ;;  %v1405_v4 = vrot.slane %v1403_v40, 4  ;;  %v1378_v55 = vsel %vm4267_vm2, %v1373_v43, %v1377_v26  ;;  %v1809_v1 = vsel %vm4440_vm5, %v3405_v50, %v1808_v41 }
  0x5a   : > { %3910 = vmatpush3.bf16.msra.mxu1 %v4107_v31  ;;  %3879 = vmatprep.subr.bf16.mxu0 %v4110_v63  ;;  %v1802_v31 = vsel %vm4440_vm5, %v3404_v21, %v1801_v19  ;;  %v4123_v19 = vld [vmem:[%s5206_s1 + $0x1f0] sm:$0xff]   ;;  %v1441_v35 = vshll.u32 %v3349_v18, 16 }
  0x5b   : > { %3911 = vmatprep.subr.bf16.mxu1 %v4111_v54  ;;  %v3428_v48 = vcombine.low %v1802_v31, %v1805_v37  ;;  %v1406_v56 = vor.u32 %v1405_v4, %v1401_v51  ;;  %v3350_v21 = vld [vmem:[%s4224_s10 + $0x34] sm:$0xf]  ;;  %v1438_v31 = vshrl.u32 %v3349_v18, 16 }
  0x5c   : > { %3832 = vmatmul.mubr.bf16.gmra.mxu0 %v3281_v2  ;;  %v1447_v40 = vshll.u32 %v3350_v21, 16  ;;  %v1443_v49 = vrot.slane %v1441_v35, 5 }
  0x5d   : > { %3864 = vmatmul.mubr.bf16.gmra.mxu1 %v4109_v60  ;;  %3880 = vmatpush3.bf16.msra.mxu0 %v4110_v63  ;;  %v4118_v60 = vld [vmem:[%s5206_s1 + $0x100] sm:$0xff]   ;;  %v1397_v63 = vrot.slane %v1396_v44, 4  ;;  %v1407_v2 = vrot.slane %v1406_v56, 4  ;;  %v1440_v39 = vrot.slane %v1438_v31, 4  ;;  %v3352_v56 = vld [vmem:[%s4224_s10 + $0x3c] sm:$0xf] }
  0x5e   : > { %3912 = vmatpush3.bf16.msra.mxu1 %v4111_v54  ;;  %3867 = vmatprep.mubr.bf16.mxu1 %v4114_v3  ;;  %v1388_v54 = vsel %vm4267_vm2, %v1383_v38, %v1387_v27  ;;  %v4121_v3 = vld [vmem:[%s5206_s1 + $0x1f8] sm:$0xff]   ;;  %v4125_v38 = vld [vmem:[%s5206_s1 + $0x1e8] sm:$0xff]   ;;  %v1449_v52 = vrot.slane %v1447_v40, 5  ;;  %v1462_v0 = vshrl.u32 %v3352_v56, 16 }
  0x5f   : > { %3913 = vmatprep.subr.bf16.mxu1 %v4113_v46  ;;  %3881 = vmatprep.subr.bf16.mxu0 %v4112_v5  ;;  %v3380_v13 = vcombine.low %v1378_v55, %v1388_v54  ;;  %v1412_v62 = vsel %vm4267_vm2, %v1407_v2, %v1411_v58  ;;  %v4623_v27 = vld [vmem:[%s4224_s10 + $0x38] sm:$0x1]  ;;  %v1444_v50 = vor.u32 %v1443_v49, %v1440_v39  ;;  %v3407_v54 = vrot.slane %v3399_v33, 9  ;;  %v3401_v31 = vld [vmem:[%s4224_s10 + $0x48] sm:$0xe] }
  0x60   : > { %3835 = vmatprep.mubr.bf16.mxu0 %v3282_v57  ;;  %v1402_v57 = vsel %vm4267_vm2, %v1397_v63, %v1401_v51  ;;  %v1457_v24 = vshll.u32 %v4623_v27, 16  ;;  %v4124_v63 = vld [vmem:[%s5206_s1 + $0x1a8] sm:$0xff]  }
  0x61   : > { %3882 = vmatpush3.bf16.msra.mxu0 %v4112_v5  ;;  %v3347_v5 = vld [vmem:[%s4224_s10 + $0x28] sm:$0xf]  ;;  %v3381_v25 = vcombine.low %v1402_v57, %v1412_v62  ;;  %v1445_v2 = vrot.slane %v1444_v50, 4 }
  0x62   : > { %3914 = vmatpush3.bf16.msra.mxu1 %v4113_v46  ;;  %3883 = vmatprep.subr.bf16.mxu0 %v4116_v9  ;;  %v1810_v46 = vrot.slane %v1808_v41, 4  ;;  %v1423_v14 = vshll.u32 %v3347_v5, 16  ;;  %v1815_v45 = vrot.slane %v3347_v5, 5  ;;  %v1459_v41 = vrot.slane %v1457_v24, 5 }
  0x63   : > { %3915 = vmatprep.subr.bf16.mxu1 %v4117_v16  ;;  %v1450_v62 = vsel %vm4267_vm2, %v1445_v2, %v1449_v52 }
  0x64   : > { %3836 = vmatmul.mubr.bf16.gmra.mxu0 %v3283_v6  ;;  %v1812_v7 = vsel %vm4440_vm5, %v1810_v46, %v1811_v59  ;;  %v1427_v6 = vshrl.u32 %v3347_v5, 16  ;;  %v1425_v22 = vrot.slane %v1423_v14, 5  ;;  %v1817_v47 = vrot.slane %v1815_v45, 4  ;;  %v3353_v46 = vld [vmem:[%s4224_s10 + $0x40] sm:$0xf] }
  0x65   : > { %3868 = vmatmul.mubr.bf16.gmra.mxu1 %v4115_v53  ;;  %3884 = vmatpush3.bf16.msra.mxu0 %v4116_v9  ;;  %v3429_v17 = vcombine.low %v1809_v1, %v1812_v7  ;;  %v1416_v53 = vrot.slane %v1414_v12, 4  ;;  %v1435_v9 = vrot.slane %v1433_v20, 5  ;;  %v4127_v1 = vld [vmem:[%s5206_s1 + $0x1e0] sm:$0xff]   ;;  %v1465_v5 = vshll.u32 %v3352_v56, 16  ;;  %v3356_v20 = vld [vmem:[%s4224_s10 + $0x4c] sm:$0xf] }
  0x66   : > { %3916 = vmatpush3.bf16.msra.mxu1 %v4117_v16  ;;  %3919 = vmatprep.mubr.bf16.mxu1 %v3428_v48  ;;  %v3398_v16 = vld [vmem:[%s4224_s10 + $0x24] sm:$0xe]  ;;  %v1429_v23 = vrot.slane %v1427_v6, 4  ;;  %v1819_v48 = vsel %vm4440_vm5, %v1817_v47, %v1818_v30  ;;  %v1471_v57 = vshll.u32 %v3353_v46, 16  ;;  %v1475_v15 = vshrl.u32 %v3353_v46, 16 }
  0x67   : > { %3917 = vmatprep.subr.bf16.mxu1 %v4119_v42  ;;  %3885 = vmatprep.subr.bf16.mxu0 %v4118_v60  ;;  %v3406_v26 = vrot.slane %v3398_v16, 9  ;;  %v1420_v28 = vor.u32 %v1419_v8, %v1416_v53  ;;  %v3400_v16 = vld [vmem:[%s4224_s10 + $0x3c] sm:$0xe]  ;;  %v1467_v14 = vrot.slane %v1465_v5, 5  ;;  %v3355_v8 = vld [vmem:[%s4224_s10 + $0x48] sm:$0xf] }
  0x68   : > { %3887 = vmatprep.mubr.bf16.mxu0 %v3380_v13  ;;  %v1430_v61 = vor.u32 %v1429_v23, %v1425_v22  ;;  %v1825_v13 = vrot.slane %v4623_v27, 5  ;;  %v1473_v6 = vrot.slane %v1471_v57, 5  ;;  %v4129_v27 = vld [vmem:[%s5206_s1 + $0x1d8] sm:$0xff]   ;;  %v1495_v47 = vshll.u32 %v3356_v20, 16  ;;  %v3358_v56 = vld [vmem:[%s4224_s10 + $0x54] sm:$0xf] }
  0x69   : > { %3886 = vmatpush3.bf16.msra.mxu0 %v4118_v60  ;;  %v1816_v34 = vsel %vm4440_vm5, %v3406_v26, %v1815_v45  ;;  %v1421_v37 = vrot.slane %v1420_v28, 4  ;;  %v1822_v60 = vrot.slane %v3350_v21, 5  ;;  %v3408_v26 = vrot.slane %v3400_v16, 9  ;;  %v4666_v45 = vld [vmem:[%s4224_s10 + $0x50] sm:$0x1] }
  0x6a   : > { %3918 = vmatpush3.bf16.msra.mxu1 %v4119_v42  ;;  %3935 = vmatprep.subr.bf16.mxu0 %v4120_v10  ;;  %v1451_v42 = vshrl.u32 %v3350_v21, 16  ;;  %v1431_v43 = vrot.slane %v1430_v61, 4  ;;  %v3430_v4 = vcombine.low %v1816_v34, %v1819_v48  ;;  %v1486_v61 = vshrl.u32 %v3355_v8, 16  ;;  %v3402_v16 = vld [vmem:[%s4224_s10 + $0x54] sm:$0xe] }
  0x6b   : > { %3967 = vmatprep.subr.bf16.mxu1 %v4121_v3  ;;  %v1426_v51 = vsel %vm4267_vm2, %v1421_v37, %v1425_v22  ;;  %v1823_v11 = vsel %vm4440_vm5, %v3407_v54, %v1822_v60  ;;  %v1824_v12 = vrot.slane %v1822_v60, 4  ;;  %v1489_v34 = vshll.u32 %v3355_v8, 16  ;;  %v3361_v8 = vld [vmem:[%s4224_s10 + $0x60] sm:$0xf] }
  0x6c   : > { %3888 = vmatmul.mubr.bf16.vlgmr.msra.gmra.mxu0 %v3381_v25  ;;  %v1453_v55 = vrot.slane %v1451_v42, 4  ;;  %v1436_v44 = vsel %vm4267_vm2, %v1431_v43, %v1435_v9  ;;  %v1829_v9 = vrot.slane %v3353_v46, 5  ;;  %v1499_v40 = vshrl.u32 %v3356_v20, 16  ;;  %v4128_v42 = vld [vmem:[%s5206_s1 + $0x198] sm:$0xff]   ;;  %v4133_v46 = vld [vmem:[%s5206_s1 + $0x1c8] sm:$0xff]  }
  0x6d   : > { %3920 = vmatmul.mubr.bf16.vlgmr.msra.gmra.mxu1 %v3429_v17  ;;  %3936 = vmatpush3.bf16.msra.mxu0 %v4120_v10  ;;  %v3382_v58 = vcombine.low %v1426_v51, %v1436_v44  ;;  %v4126_v17 = vld [vmem:[%s5206_s1 + $0x1a0] sm:$0xff]   ;;  %v1464_v10 = vrot.slane %v1462_v0, 4  ;;  %v1826_v25 = vsel %vm4440_vm5, %v1824_v12, %v1825_v13  ;;  %v1488_v48 = vrot.slane %v1486_v61, 4 }
  0x6e   : > { %3968 = vmatpush3.bf16.msra.mxu1 %v4121_v3  ;;  %3937 = vmatprep.subr.bf16.mxu0 %v4122_v29  ;;  %v1454_v59 = vor.u32 %v1453_v55, %v1449_v52  ;;  %v3354_v3 = vld [vmem:[%s4224_s10 + $0x44] sm:$0x1]  ;;  %v3431_v22 = vcombine.low %v1823_v11, %v1826_v25  ;;  %v1830_v37 = vsel %vm4440_vm5, %v3408_v26, %v1829_v9  ;;  %v1831_v39 = vrot.slane %v1829_v9, 4 }
  0x6f   : > { %3969 = vmatprep.subr.bf16.mxu1 %v4123_v19  ;;  %3923 = vmatprep.mubr.bf16.mxu1 %v3430_v4  ;;  %v1481_v53 = vshll.u32 %v3354_v3, 16  ;;  %v1468_v23 = vor.u32 %v1467_v14, %v1464_v10  ;;  %v1832_v30 = vrot.slane %v3354_v3, 5  ;;  %v1491_v49 = vrot.slane %v1489_v34, 5  ;;  %v3360_v3 = vld [vmem:[%s4224_s10 + $0x5c] sm:$0x1] }
  0x70   : > { %3891 = vmatprep.mubr.bf16.mxu0 %v3382_v58  ;;  %v1455_v7 = vrot.slane %v1454_v59, 4  ;;  %v1497_v24 = vrot.slane %v1495_v47, 5  ;;  %v1501_v52 = vrot.slane %v1499_v40, 4  ;;  %v1505_v55 = vshll.u32 %v4666_v45, 16  ;;  %v3359_v58 = vld [vmem:[%s4224_s10 + $0x58] sm:$0xf] }
  0x71   : > { %3938 = vmatpush3.bf16.msra.mxu0 %v4122_v29  ;;  %v1483_v28 = vrot.slane %v1481_v53, 5  ;;  %v1469_v33 = vrot.slane %v1468_v23, 4  ;;  %v1833_v4 = vsel %vm4440_vm5, %v1831_v39, %v1832_v30  ;;  %v3409_v54 = vrot.slane %v3401_v31, 9  ;;  %v3403_v31 = vld [vmem:[%s4224_s10 + $0x60] sm:$0xe] }
  0x72   : > { %3970 = vmatpush3.bf16.msra.mxu1 %v4123_v19  ;;  %v1460_v18 = vsel %vm4267_vm2, %v1455_v7, %v1459_v41  ;;  %3939 = vmatprep.subr.bf16.mxu0 %v4124_v63  ;;  %v1477_v19 = vrot.slane %v1475_v15, 4  ;;  %v3432_v50 = vcombine.low %v1830_v37, %v1833_v4  ;;  %v1492_v41 = vor.u32 %v1491_v49, %v1488_v48 }
  0x73   : > { %3971 = vmatprep.subr.bf16.mxu1 %v4125_v38  ;;  %v3383_v21 = vcombine.low %v1450_v62, %v1460_v18  ;;  %v1474_v43 = vsel %vm4267_vm2, %v1469_v33, %v1473_v6  ;;  %v1502_v59 = vor.u32 %v1501_v52, %v1497_v24  ;;  %v1507_v60 = vrot.slane %v1505_v55, 5 }
  0x74   : > { %v1478_v29 = vor.u32 %v1477_v19, %v1473_v6  ;;  %v1836_v13 = vrot.slane %v3356_v20, 5  ;;  %v1493_v2 = vrot.slane %v1492_v41, 4  ;;  %v1510_v0 = vshrl.u32 %v3358_v56, 16  ;;  %v4132_v6 = vld [vmem:[%s5206_s1 + $0x188] sm:$0xff]   ;;  %v3362_v20 = vld [vmem:[%s4224_s10 + $0x64] sm:$0xf] }
  0x75   : > { %3892 = vmatmul.mubr.bf16.gmra.mxu0 %v3383_v21  ;;  %3924 = vmatmul.mubr.bf16.gmra.mxu1 %v3431_v22  ;;  %v1513_v5 = vshll.u32 %v3358_v56, 16  ;;  %v1519_v57 = vshll.u32 %v3359_v58, 16  ;;  %v1503_v7 = vrot.slane %v1502_v59, 4  ;;  %v1523_v15 = vshrl.u32 %v3359_v58, 16 }
  0x76   : > { %3972 = vmatpush3.bf16.msra.mxu1 %v4125_v38  ;;  %3940 = vmatpush3.bf16.msra.mxu0 %v4124_v63  ;;  %v1479_v35 = vrot.slane %v1478_v29, 4  ;;  %v4131_v38 = vld [vmem:[%s5206_s1 + $0x1d0] sm:$0xff]   ;;  %v1839_v63 = vrot.slane %v4666_v45, 5  ;;  %v1837_v11 = vsel %vm4440_vm5, %v3409_v54, %v1836_v13  ;;  %v1838_v12 = vrot.slane %v1836_v13, 4  ;;  %v4712_v45 = vld [vmem:[%s4224_s10 + $0x68] sm:$0x1] }
  0x77   : > { %3973 = vmatprep.subr.bf16.mxu1 %v4127_v1  ;;  %3941 = vmatprep.subr.bf16.mxu0 %v4126_v17  ;;  %v1498_v62 = vsel %vm4267_vm2, %v1493_v2, %v1497_v24  ;;  %v1515_v10 = vrot.slane %v1513_v5, 5  ;;  %v1521_v14 = vrot.slane %v1519_v57, 5  ;;  %v1508_v18 = vsel %vm4267_vm2, %v1503_v7, %v1507_v60  ;;  %v3492_v13 = vld [vmem:[%s4224_s10 + $0x18] sm:$0xf] }
  0x78   : > { %v1484_v51 = vsel %vm4267_vm2, %v1479_v35, %v1483_v28  ;;  %3927 = vmatprep.mubr.bf16.mxu1 %v3432_v50  ;;  %v1840_v25 = vsel %vm4440_vm5, %v1838_v12, %v1839_v63  ;;  %v1525_v19 = vrot.slane %v1523_v15, 4  ;;  %v1529_v53 = vshll.u32 %v3360_v3, 16 }
  0x79   : > { %v3384_v44 = vcombine.low %v1474_v43, %v1484_v51  ;;  %v3385_v21 = vcombine.low %v1498_v62, %v1508_v18  ;;  %v3433_v22 = vcombine.low %v1837_v11, %v1840_v25  ;;  %v3410_v26 = vrot.slane %v3402_v16, 9  ;;  %v4136_v11 = vld [vmem:[%s4224_s10 + $0x18] sm:$0xff]   ;;  %v4758_v18 = vld [vmem:[%s4224_s10 + $0x28] sm:$0xf] }
  0x7a   : > { %3974 = vmatpush3.bf16.msra.mxu1 %v4127_v1  ;;  %3942 = vmatpush3.bf16.msra.mxu0 %v4126_v17  ;;  %v4130_v1 = vld [vmem:[%s5206_s1 + $0x190] sm:$0xff]   ;;  %v1512_v17 = vrot.slane %v1510_v0, 4  ;;  %v1526_v29 = vor.u32 %v1525_v19, %v1521_v14  ;;  %v1531_v28 = vrot.slane %v1529_v53, 5  ;;  %v1843_v9 = vrot.slane %v3359_v58, 5 }
  0x7b   : > { %3975 = vmatprep.subr.bf16.mxu1 %v4129_v27  ;;  %3895 = vmatprep.mubr.bf16.mxu0 %v3384_v44  ;;  %v1846_v30 = vrot.slane %v3360_v3, 5  ;;  %v1534_v61 = vshrl.u32 %v3361_v8, 16  ;;  %v1537_v34 = vshll.u32 %v3361_v8, 16  ;;  %v1543_v47 = vshll.u32 %v3362_v20, 16 }
  0x7c   : > { %3943 = vmatprep.subr.bf16.mxu0 %v4128_v42  ;;  %v1516_v23 = vor.u32 %v1515_v10, %v1512_v17  ;;  %v1527_v35 = vrot.slane %v1526_v29, 4  ;;  %v1844_v37 = vsel %vm4440_vm5, %v3410_v26, %v1843_v9  ;;  %v1845_v39 = vrot.slane %v1843_v9, 4 }
  0x7d   : > { %3896 = vmatmul.mubr.bf16.gmra.mxu0 %v3385_v21  ;;  %3928 = vmatmul.mubr.bf16.gmra.mxu1 %v3433_v22  ;;  %v1547_v40 = vshrl.u32 %v3362_v20, 16  ;;  %v1536_v48 = vrot.slane %v1534_v61, 4  ;;  %v1539_v49 = vrot.slane %v1537_v34, 5  ;;  %v1545_v24 = vrot.slane %v1543_v47, 5  ;;  %v4137_v61 = vld [vmem:[%s4224_s10 + $0x24] sm:$0xff]  }
  0x7e   : > { %3976 = vmatpush3.bf16.msra.mxu1 %v4129_v27  ;;  %3944 = vmatpush3.bf16.msra.mxu0 %v4128_v42  ;;  %v4135_v27 = vld [vmem:[%s5206_s1 + $0x1c0] sm:$0xff]   ;;  %v1517_v33 = vrot.slane %v1516_v23, 4  ;;  %v1532_v51 = vsel %vm4267_vm2, %v1527_v35, %v1531_v28  ;;  %v1847_v4 = vsel %vm4440_vm5, %v1845_v39, %v1846_v30  ;;  %v1553_v55 = vshll.u32 %v4712_v45, 16 }
  0x7f   : > { %3977 = vmatprep.subr.bf16.mxu1 %v4131_v38  ;;  %3945 = vmatprep.subr.bf16.mxu0 %v4130_v1  ;;  %v4134_v42 = vld [vmem:[%s5206_s1 + $0x180] sm:$0xff]   ;;  %v1549_v52 = vrot.slane %v1547_v40, 4  ;;  %v3434_v50 = vcombine.low %v1844_v37, %v1847_v4  ;;  %v1540_v41 = vor.u32 %v1539_v49, %v1536_v48  ;;  %v3411_v54 = vrot.slane %v3403_v31, 9  ;;  %v3498_v40 = vld [vmem:[%s4224_s10 + $0x30] sm:$0xf] }
  0x80   : > { %v1522_v43 = vsel %vm4267_vm2, %v1517_v33, %v1521_v14  ;;  %v1555_v58 = vrot.slane %v1553_v55, 5  ;;  %v1850_v59 = vrot.slane %v3362_v20, 5  ;;  %v1853_v60 = vrot.slane %v4712_v45, 5  ;;  %v4761_v20 = vld [vmem:[%s4224_s10 + $0x2c] sm:$0x1]  ;;  %v4779_v49 = vld [vmem:[%s5206_s1 + $0x230] sm:$0xff]  }
  0x81   : > { %v3386_v44 = vcombine.low %v1522_v43, %v1532_v51  ;;  %v1550_v56 = vor.u32 %v1549_v52, %v1545_v24  ;;  %3931 = vmatprep.mubr.bf16.mxu1 %v3434_v50  ;;  %v1541_v63 = vrot.slane %v1540_v41, 4  ;;  %v2333_v2 = vshrl.u32 %v3492_v13, 16 }
  0x82   : > { %3978 = vmatpush3.bf16.msra.mxu1 %v4131_v38  ;;  %3946 = vmatpush3.bf16.msra.mxu0 %v4130_v1  ;;  %v4728_v38 = vld [vmem:[%s5206_s1 + $0x238] sm:$0xff]   ;;  %v1851_v0 = vsel %vm4440_vm5, %v3411_v54, %v1850_v59  ;;  %v1852_v5 = vrot.slane %v1850_v59, 4  ;;  %v2336_v57 = vshll.u32 %v3492_v13, 16  ;;  %v2370_v29 = vshrl.u32 %v4758_v18, 16 }
  0x83   : > { %3979 = vmatprep.subr.bf16.mxu1 %v4133_v46  ;;  %3947 = vmatprep.subr.bf16.mxu0 %v4132_v6  ;;  %v4738_v1 = vld [vmem:[%s4224_s10 + $0x1c] sm:$0xf]  ;;  %v1551_v3 = vrot.slane %v1550_v56, 4  ;;  %v1546_v7 = vsel %vm4267_vm2, %v1541_v63, %v1545_v24  ;;  %v2335_v12 = vrot.slane %v2333_v2, 4  ;;  %v2376_v28 = vshll.u32 %v4761_v20, 16 }
  0x84   : > { %3899 = vmatprep.mubr.bf16.mxu0 %v3386_v44  ;;  %v2342_v15 = vshll.u32 %v4738_v1, 16  ;;  %v2346_v16 = vshrl.u32 %v4738_v1, 16  ;;  %v1854_v17 = vsel %vm4440_vm5, %v1852_v5, %v1853_v60  ;;  %v2338_v10 = vrot.slane %v2336_v57, 5  ;;  %v4782_v24 = vld [vmem:[%s4224_s10 + $0x38] sm:$0x1]  ;;  %v4140_v44 = vld [vmem:[%s4224_s10 + $0x30] sm:$0xff]  }
  0x85   : > { %v1556_v62 = vsel %vm4267_vm2, %v1551_v3, %v1555_v58  ;;  %v3435_v19 = vcombine.low %v1851_v0, %v1854_v17  ;;  %v2372_v47 = vrot.slane %v2370_v29, 4  ;;  %v2378_v35 = vrot.slane %v2376_v28, 5  ;;  %v3501_v60 = vld [vmem:[%s4224_s10 + $0x3c] sm:$0xf]  ;;  %v4792_v3 = vld [vmem:[%s4224_s10 + $0x40] sm:$0xf] }
  0x86   : > { %3980 = vmatpush3.bf16.msra.mxu1 %v4133_v46  ;;  %3948 = vmatpush3.bf16.msra.mxu0 %v4132_v6  ;;  %v4741_v46 = vld [vmem:[%s4224_s10 + $0x20] sm:$0x1]  ;;  %v3495_v6 = vld [vmem:[%s4224_s10 + $0x24] sm:$0xf]  ;;  %v3387_v25 = vcombine.low %v1546_v7, %v1556_v62  ;;  %v2344_v53 = vrot.slane %v2342_v15, 5  ;;  %v2348_v8 = vrot.slane %v2346_v16, 4  ;;  %v2339_v21 = vor.u32 %v2338_v10, %v2335_v12 }
  0x87   : > { %3981 = vmatprep.subr.bf16.mxu1 %v4135_v27  ;;  %3949 = vmatprep.subr.bf16.mxu0 %v4134_v42  ;;  %v2352_v14 = vshll.u32 %v4741_v46, 16  ;;  %v2357_v23 = vshrl.u32 %v3495_v6, 16  ;;  %v2360_v26 = vshll.u32 %v3495_v6, 16  ;;  %v2381_v51 = vshrl.u32 %v3498_v40, 16  ;;  %v4795_v0 = vld [vmem:[%s4224_s10 + $0x44] sm:$0x1] }
  0x88   : > { %3900 = vmatmul.mubr.bf16.gmra.mxu0 %v3387_v25  ;;  %3932 = vmatmul.mubr.bf16.gmra.mxu1 %v3435_v19  ;;  %v2349_v45 = vor.u32 %v2348_v8, %v2344_v53  ;;  %v2340_v9 = vrot.slane %v2339_v21, 4  ;;  %v2384_v4 = vshll.u32 %v3498_v40, 16  ;;  %v2400_v59 = vshll.u32 %v4782_v24, 16  ;;  %v4802_v12 = vld [vmem:[%s5206_s1 + $0x228] sm:$0xff]  }
  0x89   : > { %v2354_v22 = vrot.slane %v2352_v14, 5  ;;  %3951 = vmatprep.mubr.bf16.mxu0 %v4136_v11  ;;  %v2359_v30 = vrot.slane %v2357_v23, 4  ;;  %v2362_v31 = vrot.slane %v2360_v26, 5  ;;  %v2383_v56 = vrot.slane %v2381_v51, 4  ;;  %v4816_v29 = vld [vmem:[%s4224_s10 + $0x4c] sm:$0xf] }
  0x8a   : > { %3982 = vmatpush3.bf16.msra.mxu1 %v4135_v27  ;;  %3950 = vmatpush3.bf16.msra.mxu0 %v4134_v42  ;;  %v2366_v27 = vshll.u32 %v4758_v18, 16  ;;  %v2350_v33 = vrot.slane %v2349_v45, 4  ;;  %v2345_v37 = vsel %vm4267_vm2, %v2340_v9, %v2344_v53  ;;  %v4772_v42 = vld [vmem:[%s4224_s10 + $0x34] sm:$0xf]  ;;  %v2386_v58 = vrot.slane %v2384_v4, 5  ;;  %v4141_v53 = vld [vmem:[%s4224_s10 + $0x3c] sm:$0xff]  }
  0x8b   : > { %4031 = vmatprep.subr.bf16.mxu1 %v4728_v38  ;;  %3999 = vmatprep.subr.bf16.mxu0 %v4728_v38  ;;  %v2363_v39 = vor.u32 %v2362_v31, %v2359_v30  ;;  %v2390_v50 = vshll.u32 %v4772_v42, 16  ;;  %v2394_v41 = vshrl.u32 %v4772_v42, 16  ;;  %v2402_v7 = vrot.slane %v2400_v59, 5  ;;  %v4144_v45 = vld [vmem:[%s4224_s10 + $0x48] sm:$0xff]   ;;  %v4828_v30 = vld [vmem:[%s4224_s10 + $0x50] sm:$0x1] }
  0x8c   : > { %v2368_v34 = vrot.slane %v2366_v27, 5  ;;  %v2355_v43 = vsel %vm4267_vm2, %v2350_v33, %v2354_v22  ;;  %v2387_v57 = vor.u32 %v2386_v58, %v2383_v56  ;;  %v2405_v11 = vshrl.u32 %v3501_v60, 16  ;;  %v3504_v27 = vld [vmem:[%s4224_s10 + $0x48] sm:$0xf]  ;;  %v4836_v51 = vld [vmem:[%s4224_s10 + $0x58] sm:$0xf] }
  0x8d   : > { %v3532_v52 = vcombine.low %v2345_v37, %v2355_v43  ;;  %v2364_v55 = vrot.slane %v2363_v39, 4  ;;  %v2392_v63 = vrot.slane %v2390_v50, 5  ;;  %v2396_v2 = vrot.slane %v2394_v41, 4  ;;  %v3507_v37 = vld [vmem:[%s4224_s10 + $0x54] sm:$0xf] }
  0x8e   : > { %v2373_v48 = vor.u32 %v2372_v47, %v2368_v34  ;;  %v2408_v62 = vshll.u32 %v3501_v60, 16  ;;  %v2414_v17 = vshll.u32 %v4792_v3, 16  ;;  %v2388_v10 = vrot.slane %v2387_v57, 4 }
  0x8f   : > { %3983 = vmatprep.mubr.bf16.mxu1 %v3532_v52  ;;  %v2369_v13 = vsel %vm4267_vm2, %v2364_v55, %v2368_v34  ;;  %v2397_v16 = vor.u32 %v2396_v2, %v2392_v63  ;;  %v2407_v14 = vrot.slane %v2405_v11, 4  ;;  %v2418_v6 = vshrl.u32 %v4792_v3, 16  ;;  %v4146_v11 = vld [vmem:[%s5206_s1 + $0x218] sm:$0xff]  }
  0x90   : > { %v2374_v54 = vrot.slane %v2373_v48, 4  ;;  %3952 = vmatmul.mubr.bf16.vlgmr.msra.gmra.mxu0 %v4137_v61  ;;  %v2424_v25 = vshll.u32 %v4795_v0, 16  ;;  %v2410_v8 = vrot.slane %v2408_v62, 5  ;;  %v2416_v21 = vrot.slane %v2414_v17, 5 }
  0x91   : > { %4000 = vmatpush3.bf16.msra.mxu0 %v4728_v38  ;;  %3955 = vmatprep.mubr.bf16.mxu0 %v4140_v44  ;;  %v2398_v19 = vrot.slane %v2397_v16, 4  ;;  %v2393_v22 = vsel %vm4267_vm2, %v2388_v10, %v2392_v63  ;;  %v2420_v23 = vrot.slane %v2418_v6, 4  ;;  %v2429_v31 = vshrl.u32 %v3504_v27, 16  ;;  %v4840_v44 = vld [vmem:[%s4224_s10 + $0x5c] sm:$0x1] }
  0x92   : > { %v2379_v5 = vsel %vm4267_vm2, %v2374_v54, %v2378_v35  ;;  %4001 = vmatprep.subr.bf16.mxu0 %v4779_v49  ;;  %v2426_v26 = vrot.slane %v2424_v25, 5  ;;  %v2411_v9 = vor.u32 %v2410_v8, %v2407_v14  ;;  %v2432_v33 = vshll.u32 %v3504_v27, 16 }
  0x93   : > { %v3533_v15 = vcombine.low %v2369_v13, %v2379_v5  ;;  %v2403_v28 = vsel %vm4267_vm2, %v2398_v19, %v2402_v7  ;;  %v2421_v34 = vor.u32 %v2420_v23, %v2416_v21  ;;  %v2438_v47 = vshll.u32 %v4816_v29, 16  ;;  %v4145_v5 = vld [vmem:[%s4224_s10 + $0x54] sm:$0xff]   ;;  %v3510_v19 = vld [vmem:[%s4224_s10 + $0x60] sm:$0xf] }
  0x94   : > { %v3534_v61 = vcombine.low %v2393_v22, %v2403_v28  ;;  %v2442_v35 = vshrl.u32 %v4816_v29, 16  ;;  %v2412_v39 = vrot.slane %v2411_v9, 4  ;;  %v2431_v40 = vrot.slane %v2429_v31, 4  ;;  %v4148_v23 = vld [vmem:[%s4224_s10 + $0x60] sm:$0xff]  }
  0x95   : > { %3984 = vmatmul.mubr.bf16.vlgmr.msra.gmra.mxu1 %v3533_v15  ;;  %4002 = vmatpush3.bf16.msra.mxu0 %v4779_v49  ;;  %v2434_v43 = vrot.slane %v2432_v33, 5  ;;  %v2448_v48 = vshll.u32 %v4828_v30, 16  ;;  %v2422_v4 = vrot.slane %v2421_v34, 4  ;;  %v2440_v52 = vrot.slane %v2438_v47, 5 }
  0x96   : > { %4039 = vmatpush3.bf16.msra.mxu1 %v4728_v38  ;;  %v4825_v38 = vld [vmem:[%s5206_s1 + $0x220] sm:$0xff]   ;;  %4003 = vmatprep.subr.bf16.mxu0 %v4802_v12  ;;  %v2444_v55 = vrot.slane %v2442_v35, 4  ;;  %v2453_v50 = vshrl.u32 %v3507_v37, 16  ;;  %v2417_v41 = vsel %vm4267_vm2, %v2412_v39, %v2416_v21  ;;  %v2456_v58 = vshll.u32 %v3507_v37, 16  ;;  %v3513_v35 = vld [vmem:[%s4224_s10 + $0x6c] sm:$0xf] }
  0x97   : > { %4032 = vmatprep.subr.bf16.mxu1 %v4779_v49  ;;  %3987 = vmatprep.mubr.bf16.mxu1 %v3534_v61  ;;  %v2435_v54 = vor.u32 %v2434_v43, %v2431_v40  ;;  %v2450_v56 = vrot.slane %v2448_v48, 5  ;;  %v2462_v13 = vshll.u32 %v4836_v51, 16  ;;  %v2466_v7 = vshrl.u32 %v4836_v51, 16  ;;  %v4890_v43 = vld [vmem:[%s4224_s10 + $0x70] sm:$0xf] }
  0x98   : > { %3956 = vmatmul.mubr.bf16.gmra.mxu0 %v4141_v53  ;;  %v2445_v59 = vor.u32 %v2444_v55, %v2440_v52  ;;  %v2455_v60 = vrot.slane %v2453_v50, 4  ;;  %v2458_v57 = vrot.slane %v2456_v58, 5  ;;  %v2472_v62 = vshll.u32 %v4840_v44, 16  ;;  %v4869_v53 = vld [vmem:[%s4224_s10 + $0x64] sm:$0xf] }
  0x99   : > { %4004 = vmatpush3.bf16.msra.mxu0 %v4802_v12  ;;  %3959 = vmatprep.mubr.bf16.mxu0 %v4144_v45  ;;  %v2436_v2 = vrot.slane %v2435_v54, 4  ;;  %v2464_v16 = vrot.slane %v2462_v13, 5  ;;  %v2803_v17 = vrot.slane %v4836_v51, 5  ;;  %v2468_v6 = vrot.slane %v2466_v7, 4  ;;  %v4893_v48 = vld [vmem:[%s4224_s10 + $0x74] sm:$0x1] }
  0x9a   : > { %4040 = vmatpush3.bf16.msra.mxu1 %v4779_v49  ;;  %v2427_v49 = vsel %vm4267_vm2, %v2422_v4, %v2426_v26  ;;  %4005 = vmatprep.subr.bf16.mxu0 %v4825_v38  ;;  %v2446_v15 = vrot.slane %v2445_v59, 4  ;;  %v2459_v14 = vor.u32 %v2458_v57, %v2455_v60  ;;  %v2806_v25 = vrot.slane %v4840_v44, 5  ;;  %v4880_v26 = vld [vmem:[%s4224_s10 + $0x68] sm:$0x1] }
  0x9b   : > { %4033 = vmatprep.subr.bf16.mxu1 %v4802_v12  ;;  %v3535_v63 = vcombine.low %v2417_v41, %v2427_v49  ;;  %v2441_v10 = vsel %vm4267_vm2, %v2436_v2, %v2440_v52  ;;  %v2474_v21 = vrot.slane %v2472_v62, 5  ;;  %v4876_v22 = vrot.slane %v2803_v17, 4 }
  0x9c   : > { %v2451_v8 = vsel %vm4267_vm2, %v2446_v15, %v2450_v56  ;;  %v2477_v45 = vshrl.u32 %v3510_v19, 16  ;;  %v2460_v28 = vrot.slane %v2459_v14, 4  ;;  %v2469_v9 = vor.u32 %v2468_v6, %v2464_v16  ;;  %v3552_v14 = vld [vmem:[%s4224_s10 + $0x48] sm:$0xe] }
  0x9d   : > { %3988 = vmatmul.mubr.bf16.gmra.mxu1 %v3535_v63  ;;  %4006 = vmatpush3.bf16.msra.mxu0 %v4825_v38  ;;  %v3536_v27 = vcombine.low %v2441_v10, %v2451_v8  ;;  %v2480_v31 = vshll.u32 %v3510_v19, 16  ;;  %v2486_v61 = vshll.u32 %v4869_v53, 16  ;;  %v2490_v34 = vshrl.u32 %v4869_v53, 16  ;;  %v3548_v63 = vld [vmem:[%s4224_s10 + $0x18] sm:$0xe] }
  0x9e   : > { %4041 = vmatpush3.bf16.msra.mxu1 %v4802_v12  ;;  %v4865_v12 = vld [vmem:[%s5206_s1 + $0x210] sm:$0xff]   ;;  %4007 = vmatprep.subr.bf16.mxu0 %v4146_v11  ;;  %v2479_v33 = vrot.slane %v2477_v45, 4  ;;  %v2496_v47 = vshll.u32 %v4880_v26, 16  ;;  %v2465_v37 = vsel %vm4267_vm2, %v2460_v28, %v2464_v16  ;;  %v2470_v39 = vrot.slane %v2469_v9, 4  ;;  %v3549_v45 = vld [vmem:[%s4224_s10 + $0x24] sm:$0xe] }
  0x9f   : > { %4034 = vmatprep.subr.bf16.mxu1 %v4825_v38  ;;  %3991 = vmatprep.mubr.bf16.mxu1 %v3536_v27  ;;  %v2482_v40 = vrot.slane %v2480_v31, 5  ;;  %v2488_v4 = vrot.slane %v2486_v61, 5  ;;  %v2492_v52 = vrot.slane %v2490_v34, 4  ;;  %v2501_v50 = vshrl.u32 %v3513_v35, 16  ;;  %v3553_v34 = vld [vmem:[%s4224_s10 + $0x54] sm:$0xe] }
  0xa0   : > { %3960 = vmatmul.mubr.bf16.gmra.mxu0 %v4145_v5  ;;  %v2498_v55 = vrot.slane %v2496_v47, 5  ;;  %v2475_v41 = vsel %vm4267_vm2, %v2470_v39, %v2474_v21  ;;  %v2504_v56 = vshll.u32 %v3513_v35, 16  ;;  %v2510_v58 = vshll.u32 %v4890_v43, 16  ;;  %v4149_v5 = vld [vmem:[%s4224_s10 + $0x6c] sm:$0xff]   ;;  %v4151_v21 = vld [vmem:[%s5206_s1 + $0x200] sm:$0xff]  }
  0xa1   : > { %4008 = vmatpush3.bf16.msra.mxu0 %v4146_v11  ;;  %3963 = vmatprep.mubr.bf16.mxu0 %v4148_v23  ;;  %v2483_v54 = vor.u32 %v2482_v40, %v2479_v33  ;;  %v3537_v49 = vcombine.low %v2465_v37, %v2475_v41  ;;  %v2493_v59 = vor.u32 %v2492_v52, %v2488_v4  ;;  %v2503_v60 = vrot.slane %v2501_v50, 4  ;;  %v3550_v39 = vld [vmem:[%s4224_s10 + $0x30] sm:$0xe] }
  0xa2   : > { %4042 = vmatpush3.bf16.msra.mxu1 %v4825_v38  ;;  %v4898_v38 = vld [vmem:[%s5206_s1 + $0x208] sm:$0xff]   ;;  %4009 = vmatprep.subr.bf16.mxu0 %v4865_v12  ;;  %v2514_v13 = vshrl.u32 %v4890_v43, 16  ;;  %v2506_v57 = vrot.slane %v2504_v56, 5  ;;  %v2512_v7 = vrot.slane %v2510_v58, 5  ;;  %v2520_v15 = vshll.u32 %v4893_v48, 16 }
  0xa3   : > { %4035 = vmatprep.subr.bf16.mxu1 %v4146_v11  ;;  %v2484_v2 = vrot.slane %v2483_v54, 4  ;;  %v2494_v16 = vrot.slane %v2493_v59, 4  ;;  %v3556_v62 = vrot.slane %v3548_v63, 9  ;;  %v2768_v10 = vrot.slane %v4738_v1, 5  ;;  %v3554_v59 = vld [vmem:[%s4224_s10 + $0x60] sm:$0xe] }
  0xa4   : > { %v2507_v19 = vor.u32 %v2506_v57, %v2503_v60  ;;  %v2522_v8 = vrot.slane %v2520_v15, 5  ;;  %v2771_v23 = vrot.slane %v4741_v46, 5  ;;  %v3560_v61 = vrot.slane %v3552_v14, 9  ;;  %v3555_v15 = vld [vmem:[%s4224_s10 + $0x6c] sm:$0xe] }
  0xa5   : > { %3992 = vmatmul.mubr.bf16.gmra.mxu1 %v3537_v49  ;;  %4010 = vmatpush3.bf16.msra.mxu0 %v4865_v12  ;;  %v2489_v6 = vsel %vm4267_vm2, %v2484_v2, %v2488_v4  ;;  %v2499_v1 = vsel %vm4267_vm2, %v2494_v16, %v2498_v55  ;;  %v2769_v28 = vsel %vm4440_vm5, %v3556_v62, %v2768_v10  ;;  %v2770_v9 = vrot.slane %v2768_v10, 4 }
  0xa6   : > { %4043 = vmatpush3.bf16.msra.mxu1 %v4146_v11  ;;  %v2516_v11 = vrot.slane %v2514_v13, 4  ;;  %4011 = vmatprep.subr.bf16.mxu0 %v4898_v38  ;;  %v3538_v31 = vcombine.low %v2489_v6, %v2499_v1  ;;  %v2508_v33 = vrot.slane %v2507_v19, 4  ;;  %v2796_v46 = vrot.slane %v4816_v29, 5 }
  0xa7   : > { %4036 = vmatprep.subr.bf16.mxu1 %v4865_v12  ;;  %v2799_v35 = vrot.slane %v4828_v30, 5  ;;  %v3557_v37 = vrot.slane %v3549_v45, 9  ;;  %v2775_v30 = vrot.slane %v4758_v18, 5  ;;  %v2778_v50 = vrot.slane %v4761_v20, 5  ;;  %v3551_v20 = vld [vmem:[%s4224_s10 + $0x3c] sm:$0xe] }
  0xa8   : > { %v2517_v27 = vor.u32 %v2516_v11, %v2512_v7  ;;  %3964 = vmatmul.mubr.bf16.gmra.mxu0 %v4149_v5  ;;  %3995 = vmatprep.mubr.bf16.mxu1 %v3538_v31  ;;  %v2513_v40 = vsel %vm4267_vm2, %v2508_v33, %v2512_v7  ;;  %v2797_v29 = vsel %vm4440_vm5, %v3560_v61, %v2796_v46  ;;  %v2798_v52 = vrot.slane %v2796_v46, 4  ;;  %s3598_s10 = sshll.u32 %s5246_s13, 7 }
  0xa9   : > { %4012 = vmatpush3.bf16.msra.mxu0 %v4898_v38  ;;  %v3561_v41 = vrot.slane %v3553_v34, 9  ;;  %v3558_v58 = vrot.slane %v3550_v39, 9  ;;  %v2782_v49 = vrot.slane %v4772_v42, 5  ;;  %v2777_v60 = vrot.slane %v2775_v30, 4  ;;  %s5128_s19 = scalar_lea.vmem %s5207_s2, %s3598_s10 }
  0xaa   : > { %4044 = vmatpush3.bf16.msra.mxu1 %v4865_v12  ;;  %v2518_v47 = vrot.slane %v2517_v27, 4  ;;  %v2772_v12 = vsel %vm4440_vm5, %v2770_v9, %v2771_v23  ;;  %4013 = vmatprep.subr.bf16.mxu0 %v4151_v21  ;;  %v2800_v56 = vsel %vm4440_vm5, %v2798_v52, %v2799_v35  ;;  %v2807_v18 = vsel %vm4440_vm5, %v4876_v22, %v2806_v25 }
  0xab   : > { %4037 = vmatprep.subr.bf16.mxu1 %v4898_v38  ;;  %v3580_v4 = vcombine.low %v2769_v28, %v2772_v12  ;;  %v3584_v36 = vcombine.low %v2797_v29, %v2800_v56  ;;  %v2804_v42 = vsel %vm4440_vm5, %v3561_v41, %v2803_v17  ;;  %v2783_v13 = vsel %vm4440_vm5, %v3558_v58, %v2782_v49 }
  0xac   : > { %v2523_v55 = vsel %vm4267_vm2, %v2518_v47, %v2522_v8  ;;  %v2784_v63 = vrot.slane %v2782_v49, 4  ;;  %v2785_v2 = vrot.slane %v4782_v24, 5  ;;  %v2779_v44 = vsel %vm4440_vm5, %v2777_v60, %v2778_v50 }
  0xad   : > { %v3539_v54 = vcombine.low %v2513_v40, %v2523_v55  ;;  %4015 = vmatprep.mubr.bf16.mxu0 %v3580_v4  ;;  %4014 = vmatpush3.bf16.msra.mxu0 %v4151_v21  ;;  %v3562_v25 = vrot.slane %v3554_v59, 9  ;;  %v2810_v22 = vrot.slane %v4869_v53, 5  ;;  %v2813_v5 = vrot.slane %v4880_v26, 5 }
  0xae   : > { %4045 = vmatpush3.bf16.msra.mxu1 %v4898_v38  ;;  %v2776_v38 = vsel %vm4440_vm5, %v3557_v37, %v2775_v30  ;;  %v2786_v17 = vsel %vm4440_vm5, %v2784_v63, %v2785_v2  ;;  %v3559_v57 = vrot.slane %v3551_v20, 9  ;;  %v2789_v7 = vrot.slane %v4792_v3, 5 }
  0xaf   : > { %4038 = vmatprep.subr.bf16.mxu1 %v4151_v21  ;;  %3996 = vmatmul.mubr.bf16.gmra.mxu1 %v3539_v54  ;;  %v3581_v51 = vcombine.low %v2776_v38, %v2779_v44  ;;  %v3582_v16 = vcombine.low %v2783_v13, %v2786_v17  ;;  %v2811_v24 = vsel %vm4440_vm5, %v3562_v25, %v2810_v22  ;;  %v2812_v11 = vrot.slane %v2810_v22, 4 }
  0xb0   : > { %4023 = vmatprep.mubr.bf16.mxu1 %v3584_v36  ;;  %v2792_v62 = vrot.slane %v4795_v0, 5  ;;  %v3585_v10 = vcombine.low %v2804_v42, %v2807_v18  ;;  %v2791_v53 = vrot.slane %v2789_v7, 4  ;;  %v2817_v26 = vrot.slane %v4890_v43, 5 }
  0xb1   : > { %4016 = vmatmul.mubr.bf16.vlgmr.msra.gmra.mxu0 %v3581_v51  ;;  %v2814_v14 = vsel %vm4440_vm5, %v2812_v11, %v2813_v5  ;;  %v2790_v3 = vsel %vm4440_vm5, %v3559_v57, %v2789_v7  ;;  %v3563_v6 = vrot.slane %v3555_v15, 9  ;;  %v2820_v19 = vrot.slane %v4893_v48, 5 }
  0xb2   : > { %4046 = vmatpush3.bf16.msra.mxu1 %v4151_v21  ;;  %4019 = vmatprep.mubr.bf16.mxu0 %v3582_v16  ;;  %v3586_v8 = vcombine.low %v2811_v24, %v2814_v14  ;;  %v2793_v21 = vsel %vm4440_vm5, %v2791_v53, %v2792_v62  ;;  %v2819_v0 = vrot.slane %v2817_v26, 4 }
  0xb3   : > { %v3583_v23 = vcombine.low %v2790_v3, %v2793_v21  ;;  %v2818_v43 = vsel %vm4440_vm5, %v3563_v6, %v2817_v26 }
  0xb4   : > { %v2821_v45 = vsel %vm4440_vm5, %v2819_v0, %v2820_v19 }
  0xb5   : > { %v3587_v1 = vcombine.low %v2818_v43, %v2821_v45 }
  0xb7   : > { %4024 = vmatmul.mubr.bf16.vlgmr.msra.gmra.mxu1 %v3585_v10 }
  0xb8   : > { %4027 = vmatprep.mubr.bf16.mxu1 %v3586_v8 }
  0xb9   : > { %4020 = vmatmul.mubr.bf16.gmra.mxu0 %v3583_v23 }
  0xbf   : > { %4028 = vmatmul.mubr.bf16.gmra.mxu1 %v3587_v1 }
  0xec   : > { %v3761_v27 = vpop.f32.mrf.mxu0 }
  0xed   : > { %v3793_v28 = vpop.f32.mrf.mxu1 }
  0xee   : > { %v751_v48 = vadd.f32 %v3793_v28, %v3761_v27  ;;  %v549_v9 = vpop.f32.mrf.mxu0 }
  0xef   : > { %v742_v31 = vpop.f32.mrf.mxu1 }
  0xf0   : > { %v743_v33 = vadd.f32 %v742_v31, %v549_v9  ;;  %v3762_v61 = vpop.f32.mrf.mxu0 }
  0xf1   : > { %v3794_v46 = vpop.f32.mrf.mxu1 }
  0xf2   : > { %v754_v34 = vadd.f32 %v3794_v46, %v3762_v61  ;;  %v552_v47 = vpop.f32.mrf.mxu0 }
  0xf3   : > { %v745_v12 = vpop.f32.mrf.mxu1 }
  0xf4   : > { %v746_v35 = vadd.f32 %v745_v12, %v552_v47  ;;  %v3765_v37 = vpop.f32.mrf.mxu0 }
  0xf5   : > { %v3797_v39 = vpop.f32.mrf.mxu1 }
  0xf6   : > { %v767_v40 = vadd.f32 %v3797_v39, %v3765_v37  ;;  %v565_v32 = vpop.f32.mrf.mxu0 }
  0xf7   : > { %v758_v4 = vpop.f32.mrf.mxu1 }
  0xf8   : > { %v759_v29 = vadd.f32 %v758_v4, %v565_v32  ;;  %v3766_v52 = vpop.f32.mrf.mxu0 }
  0xf9   : > { %v3798_v55 = vpop.f32.mrf.mxu1 }
  0xfa   : > { %v770_v30 = vadd.f32 %v3798_v55, %v3766_v52  ;;  %v568_v50 = vpop.f32.mrf.mxu0 }
  0xfb   : > { %v761_v41 = vpop.f32.mrf.mxu1 }
  0xfc   : > { %v762_v54 = vadd.f32 %v761_v41, %v568_v50  ;;  %v3769_v58 = vpop.f32.mrf.mxu0 }
  0xfd   : > { %v3801_v56 = vpop.f32.mrf.mxu1 }
  0xfe   : > { %v783_v59 = vadd.f32 %v3801_v56, %v3769_v58  ;;  %v581_v36 = vpop.f32.mrf.mxu0 }
  0xff   : > { %v774_v49 = vpop.f32.mrf.mxu1 }
 0x100   : > { %v775_v60 = vadd.f32 %v774_v49, %v581_v36  ;;  %v3770_v18 = vpop.f32.mrf.mxu0 }
 0x101   : > { %v3802_v38 = vpop.f32.mrf.mxu1 }
 0x102   : > { %v786_v42 = vadd.f32 %v3802_v38, %v3770_v18  ;;  %v584_v13 = vpop.f32.mrf.mxu0 }
 0x103   : > { %v777_v20 = vpop.f32.mrf.mxu1 }
 0x104   : > { %v778_v2 = vadd.f32 %v777_v20, %v584_v13  ;;  %v3773_v25 = vpop.f32.mrf.mxu0 }
 0x105   : > { %v3805_v63 = vpop.f32.mrf.mxu1 }
 0x106   : > { %v799_v5 = vadd.f32 %v3805_v63, %v3773_v25  ;;  %v597_v51 = vpop.f32.mrf.mxu0 }
 0x107   : > { %v790_v44 = vpop.f32.mrf.mxu1 }
 0x108   : > { %v791_v57 = vadd.f32 %v790_v44, %v597_v51  ;;  %v3774_v7 = vpop.f32.mrf.mxu0 }
 0x109   : > { %v3806_v22 = vpop.f32.mrf.mxu1 }
 0x10a   : > { %v802_v16 = vadd.f32 %v3806_v22, %v3774_v7  ;;  %v600_v24 = vpop.f32.mrf.mxu0 }
 0x10b   : > { %v793_v17 = vpop.f32.mrf.mxu1 }
 0x10c   : > { %v4984_v62 = vadd.f32 %v793_v17, %v600_v24  ;;  %v3825_v10 = vpop.f32.mrf.mxu0 }
 0x10d   : > { %v3857_v15 = vpop.f32.mrf.mxu1  ;;  %v1084_v26 = vadd.f32 %v3825_v10, %v751_v48 }
 0x10e   : > { %v1019_v14 = vpop.f32.mrf.mxu0 }
 0x10f   : > { %v1262_v11 = vpop.f32.mrf.mxu1  ;;  %v4986_v6 = vadd.f32 %v3857_v15, %v1084_v26  ;;  %v1082_v19 = vadd.f32 %v1019_v14, %v743_v33 }
 0x110   : > { %v3826_v8 = vpop.f32.mrf.mxu0 }
 0x111   : > { %v3858_v53 = vpop.f32.mrf.mxu1  ;;  %v4988_v0 = vadd.f32 %v1262_v11, %v1082_v19  ;;  %v1085_v23 = vadd.f32 %v3826_v8, %v754_v34 }
 0x112   : > { %v1022_v43 = vpop.f32.mrf.mxu0 }
 0x113   : > { %v1265_v3 = vpop.f32.mrf.mxu1  ;;  %v4990_v1 = vadd.f32 %v3858_v53, %v1085_v23  ;;  %v1083_v27 = vadd.f32 %v1022_v43, %v746_v35 }
 0x114   : > { %v3829_v28 = vpop.f32.mrf.mxu0 }
 0x115   : > { %v3861_v21 = vpop.f32.mrf.mxu1  ;;  %v4992_v31 = vadd.f32 %v1265_v3, %v1083_v27  ;;  %v1088_v48 = vadd.f32 %v3829_v28, %v767_v40 }
 0x116   : > { %v1035_v61 = vpop.f32.mrf.mxu0 }
 0x117   : > { %v1278_v45 = vpop.f32.mrf.mxu1  ;;  %v4994_v47 = vadd.f32 %v3861_v21, %v1088_v48  ;;  %v1086_v33 = vadd.f32 %v1035_v61, %v759_v29 }
 0x118   : > { %v3830_v12 = vpop.f32.mrf.mxu0 }
 0x119   : > { %v3862_v9 = vpop.f32.mrf.mxu1  ;;  %v4996_v39 = vadd.f32 %v1278_v45, %v1086_v33  ;;  %v1089_v34 = vadd.f32 %v3830_v12, %v770_v30 }
 0x11a   : > { %v1038_v32 = vpop.f32.mrf.mxu0 }
 0x11b   : > { %v1281_v46 = vpop.f32.mrf.mxu1  ;;  %v4998_v52 = vadd.f32 %v3862_v9, %v1089_v34  ;;  %v1087_v35 = vadd.f32 %v1038_v32, %v762_v54 }
 0x11c   : > { %v3833_v55 = vpop.f32.mrf.mxu0 }
 0x11d   : > { %v3865_v37 = vpop.f32.mrf.mxu1  ;;  %v5000_v41 = vadd.f32 %v1281_v46, %v1087_v35  ;;  %v1092_v40 = vadd.f32 %v3833_v55, %v783_v59 }
 0x11e   : > { %v1051_v56 = vpop.f32.mrf.mxu0 }
 0x11f   : > { %v1294_v4 = vpop.f32.mrf.mxu1  ;;  %v5002_v49 = vadd.f32 %v3865_v37, %v1092_v40  ;;  %v1090_v29 = vadd.f32 %v1051_v56, %v775_v60 }
 0x120   : > { %v3834_v36 = vpop.f32.mrf.mxu0 }
 0x121   : > { %v3866_v50 = vpop.f32.mrf.mxu1  ;;  %v5004_v18 = vadd.f32 %v1294_v4, %v1090_v29  ;;  %v1093_v30 = vadd.f32 %v3834_v36, %v786_v42 }
 0x122   : > { %v1054_v20 = vpop.f32.mrf.mxu0 }
 0x123   : > { %v1297_v58 = vpop.f32.mrf.mxu1  ;;  %v5006_v63 = vadd.f32 %v3866_v50, %v1093_v30  ;;  %v1091_v54 = vadd.f32 %v1054_v20, %v778_v2 }
 0x124   : > { %v3837_v44 = vpop.f32.mrf.mxu0 }
 0x125   : > { %v3869_v38 = vpop.f32.mrf.mxu1  ;;  %v5008_v22 = vadd.f32 %v1297_v58, %v1091_v54  ;;  %v1096_v59 = vadd.f32 %v3837_v44, %v799_v5 }
 0x126   : > { %v1067_v51 = vpop.f32.mrf.mxu0 }
 0x127   : > { %v1310_v13 = vpop.f32.mrf.mxu1  ;;  %v5010_v7 = vadd.f32 %v3869_v38, %v1096_v59  ;;  %v1094_v60 = vadd.f32 %v1067_v51, %v791_v57 }
 0x128   : > { %v3838_v15 = vpop.f32.mrf.mxu0 }
 0x129   : > { %v3870_v25 = vpop.f32.mrf.mxu1  ;;  %v5014_v11 = vadd.f32 %v1310_v13, %v1094_v60  ;;  %v1097_v42 = vadd.f32 %v3838_v15, %v802_v16 }
 0x12a   : > { %v1070_v10 = vpop.f32.mrf.mxu0 }
 0x12b   : > { %v1313_v17 = vpop.f32.mrf.mxu1  ;;  %v5018_v2 = vadd.f32 %v3870_v25, %v1097_v42  ;;  %v1095_v26 = vadd.f32 %v1070_v10, %v4984_v62 }
 0x12c   : > { %v3889_v14 = vpop.f32.mrf.mxu0 }
 0x12d   : > { %v5012_v24 = vpop.f32.mrf.mxu1  ;;  %v5021_v5 = vadd.f32 %v1313_v17, %v1095_v26 }
 0x12e   : > { %v1688_v19 = vpop.f32.mrf.mxu0 }
 0x12f   : > { %v5016_v53 = vpop.f32.mrf.mxu1 }
 0x130   : > { %v3890_v57 = vpop.f32.mrf.mxu0 }
 0x131   : > { %v5023_v3 = vpop.f32.mrf.mxu1 }
 0x132   : > { %v1691_v21 = vpop.f32.mrf.mxu0 }
 0x133   : > { %v5025_v8 = vpop.f32.mrf.mxu1 }
 0x135   : > { %v3893_v23 = vpop.f32.mrf.mxu0  ;;  %v5027_v43 = vpop.f32.mrf.mxu1 }
 0x137   : > { %v1704_v16 = vpop.f32.mrf.mxu0  ;;  %v5029_v45 = vpop.f32.mrf.mxu1 }
 0x139   : > { %v3894_v27 = vpop.f32.mrf.mxu0  ;;  %v5031_v28 = vpop.f32.mrf.mxu1 }
 0x13b   : > { %v5033_v62 = vpop.f32.mrf.mxu0  ;;  %v5035_v9 = vpop.f32.mrf.mxu1 }
 0x13c   : > { %5213 = vst [vmem:[#allocation2_spill] sm:$0xff] %v5035_v9  ;;  %v1753_v9 = vadd.f32 %v3889_v14, %v4986_v6  ;;  %v1752_v6 = vadd.f32 %v1691_v21, %v4992_v31  ;;  %v1757_v14 = vadd.f32 %v3893_v23, %v4994_v47 }
 0x13d   : > { %v3897_v48 = vpop.f32.mrf.mxu0  ;;  %v3929_v61 = vpop.f32.mrf.mxu1 }
 0x13f   : > { %v1720_v46 = vpop.f32.mrf.mxu0  ;;  %v5037_v33 = vpop.f32.mrf.mxu1 }
 0x141   : > { %v3898_v12 = vpop.f32.mrf.mxu0  ;;  %v5039_v37 = vpop.f32.mrf.mxu1 }
 0x143   : > { %v1723_v34 = vpop.f32.mrf.mxu0  ;;  %v5041_v32 = vpop.f32.mrf.mxu1 }
 0x148   : > { %v5043_v4 = vpop.f32.mrf.mxu0  ;;  %v5045_v35 = vpop.f32.mrf.mxu1 }
 0x149   : > { %5214 = vst [vmem:[#allocation3_spill] sm:$0xff] %v5045_v35 }
 0x14a   : > { %v5047_v55 = vpop.f32.mrf.mxu0  ;;  %v5049_v50 = vpop.f32.mrf.mxu1 }
 0x14b   : > { %5215 = vst [vmem:[#allocation4_spill] sm:$0xff] %v5049_v50 }
 0x14c   : > { %v5051_v40 = vpop.f32.mrf.mxu0  ;;  %v5053_v56 = vpop.f32.mrf.mxu1 }
 0x14d   : > { %5216 = vst [vmem:[#allocation5_spill] sm:$0xff] %v5053_v56 }
 0x14e   : > { %v5055_v58 = vpop.f32.mrf.mxu0  ;;  %v5057_v29 = vpop.f32.mrf.mxu1 }
 0x14f   : > { %5217 = vst [vmem:[#allocation6_spill] sm:$0xff] %v5057_v29 }
 0x150   : > { %v3953_v36 = vpop.f32.mrf.mxu0 }
 0x152   : > { %v2229_v38 = vpop.f32.mrf.mxu0 }
 0x154   : > { %v3954_v20 = vpop.f32.mrf.mxu0 }
 0x155   : > { %v3985_v30 = vpop.f32.mrf.mxu1 }
 0x156   : > { %v2232_v54 = vpop.f32.mrf.mxu0 }
 0x157   : > { %v2655_v13 = vpop.f32.mrf.mxu1 }
 0x158   : > { %v5063_v59 = vpop.f32.mrf.mxu0 }
 0x159   : > { %v5059_v44 = vpop.f32.mrf.mxu1  ;;  %5220 = vst [vmem:[#allocation9_spill] sm:$0xff] %v5063_v59  ;;  %v1761_v59 = vadd.f32 %v3897_v48, %v5002_v49  ;;  %v1760_v48 = vadd.f32 %v1723_v34, %v5008_v22 }
 0x15a   : > { %5218 = vst [vmem:[#allocation7_spill] sm:$0xff] %v5059_v44  ;;  %v5065_v51 = vpop.f32.mrf.mxu0 }
 0x15b   : > { %v5061_v25 = vpop.f32.mrf.mxu1  ;;  %5221 = vst [vmem:[#allocation10_spill] sm:$0xff] %v5065_v51 }
 0x15c   : > { %5219 = vst [vmem:[#allocation8_spill] sm:$0xff] %v5061_v25  ;;  %v5069_v60 = vpop.f32.mrf.mxu0 }
 0x15d   : > { %v5067_v17 = vpop.f32.mrf.mxu1  ;;  %5223 = vst [vmem:[#allocation12_spill] sm:$0xff] %v5069_v60  ;;  %v1751_v60 = vadd.f32 %v1688_v19, %v4988_v0 }
 0x15e   : > { %5222 = vst [vmem:[#allocation11_spill] sm:$0xff] %v5067_v17  ;;  %v5073_v42 = vpop.f32.mrf.mxu0 }
 0x15f   : > { %v5071_v15 = vpop.f32.mrf.mxu1  ;;  %5225 = vst [vmem:[#allocation14_spill] sm:$0xff] %v5073_v42  ;;  %v1754_v42 = vadd.f32 %v3890_v57, %v4990_v1  ;;  %v2049_v19 = vadd.f32 %v5016_v53, %v1751_v60  ;;  %v1758_v1 = vadd.f32 %v3894_v27, %v4998_v52  ;;  %v1759_v57 = vadd.f32 %v1720_v46, %v5004_v18 }
 0x160   : > { %5224 = vst [vmem:[#allocation13_spill] sm:$0xff] %v5071_v15  ;;  %v3961_v26 = vpop.f32.mrf.mxu0  ;;  %v2050_v53 = vadd.f32 %v5025_v8, %v1752_v6  ;;  %v2055_v52 = vadd.f32 %v5027_v43, %v1757_v14  ;;  %v2058_v8 = vadd.f32 %v5041_v32, %v1760_v48  ;;  %v1765_v43 = vadd.f32 %v5043_v4, %v5010_v7 }
 0x161   : > { %v5075_v10 = vpop.f32.mrf.mxu1  ;;  %v2052_v49 = vadd.f32 %v5023_v3, %v1754_v42  ;;  %v2292_v21 = vadd.f32 %v2229_v38, %v2049_v19  ;;  %v2057_v22 = vadd.f32 %v5037_v33, %v1759_v57  ;;  %v1764_v7 = vadd.f32 %v5055_v58, %v5021_v5  ;;  %v5229_v32 = vld [vmem:[#allocation7_spill] sm:$0xff]  ;;  %v5230_v38 = vld [vmem:[#allocation9_spill] sm:$0xff]  ;;  %v5237_v57 = vld [vmem:[#allocation6_spill] sm:$0xff] }
 0x162   : > { %5226 = vst [vmem:[#allocation15_spill] sm:$0xff] %v5075_v10  ;;  %v2261_v56 = vpop.f32.mrf.mxu0  ;;  %v5236_v19 = vld [vmem:[#allocation5_spill] sm:$0xff] }
 0x163   : > { %v5077_v29 = vpop.f32.mrf.mxu1  ;;  %v2295_v23 = vadd.f32 %v3954_v20, %v2052_v49  ;;  %v2718_v33 = vadd.f32 %v2655_v13, %v2292_v21  ;;  %v2300_v34 = vadd.f32 %v2261_v56, %v2057_v22  ;;  %v5234_v60 = vld [vmem:[#allocation8_spill] sm:$0xff] }
 0x164   : > { %5227 = vst [vmem:[#allocation16_spill] sm:$0xff] %v5077_v29  ;;  %v3962_v50 = vpop.f32.mrf.mxu0  ;;  %v2051_v29 = vadd.f32 %v5012_v24, %v1753_v9  ;;  %v1762_v9 = vadd.f32 %v3898_v12, %v5006_v63  ;;  %v2056_v63 = vadd.f32 %v5031_v28, %v1758_v1  ;;  %v2293_v12 = vadd.f32 %v2232_v54, %v2050_v53  ;;  %v5231_v54 = vld [vmem:[#allocation2_spill] sm:$0xff]  ;;  %v5241_v22 = vld [vmem:[#allocation12_spill] sm:$0xff] }
 0x165   : > { %v3993_v25 = vpop.f32.mrf.mxu1  ;;  %v2721_v4 = vadd.f32 %v5229_v32, %v2295_v23 }
 0x166   : > { %v2264_v35 = vpop.f32.mrf.mxu0  ;;  %v2294_v24 = vadd.f32 %v3953_v36, %v2051_v29  ;;  %v2060_v46 = vadd.f32 %v5039_v37, %v1762_v9  ;;  %v1766_v37 = vadd.f32 %v5051_v40, %v5018_v2  ;;  %v5233_v2 = vld [vmem:[#allocation10_spill] sm:$0xff]  ;;  %v2719_v42 = vadd.f32 %v5234_v60, %v2293_v12 }
 0x167   : > { %v5080_v51 = vpop.f32.mrf.mxu1  ;;  %v5242_v12 = vld [vmem:[#allocation14_spill] sm:$0xff] }
 0x168   : > { %v5082_v17 = vpop.f32.mrf.mxu0  ;;  %v2720_v3 = vadd.f32 %v3985_v30, %v2294_v24  ;;  %v2298_v30 = vadd.f32 %v5230_v38, %v2055_v52  ;;  %v2303_v56 = vadd.f32 %v3962_v50, %v2060_v46  ;;  %v2064_v1 = vadd.f32 %v5236_v19, %v1766_v37 }
 0x169   : > { %5228 = vst [vmem:[#allocation17_spill] sm:$0xff] %v5082_v17  ;;  %v5085_v15 = vpop.f32.mrf.mxu1  ;;  %v1755_v17 = vadd.f32 %v1704_v16, %v4996_v39  ;;  %v2059_v39 = vadd.f32 %v3929_v61, %v1761_v59  ;;  %v1756_v61 = vadd.f32 %v5033_v62, %v5000_v41  ;;  %v1763_v62 = vadd.f32 %v5047_v55, %v5014_v11  ;;  %v5232_v55 = vld [vmem:[#allocation3_spill] sm:$0xff] }
 0x16a   : > { %v5088_v10 = vpop.f32.mrf.mxu0  ;;  %v2063_v59 = vadd.f32 %v5232_v55, %v1765_v43  ;;  %v2062_v24 = vadd.f32 %v5237_v57, %v1764_v7  ;;  %v5243_v38 = vld [vmem:[#allocation15_spill] sm:$0xff] }
 0x16b   : > { %v5092_v44 = vpop.f32.mrf.mxu1  ;;  %v2053_v18 = vadd.f32 %v5029_v45, %v1755_v17  ;;  %v2302_v27 = vadd.f32 %v3961_v26, %v2059_v39  ;;  %v2054_v11 = vadd.f32 %v5231_v54, %v1756_v61  ;;  %v2301_v17 = vadd.f32 %v2264_v35, %v2058_v8  ;;  %v5239_v39 = vld [vmem:[#allocation11_spill] sm:$0xff] }
 0x16c   : > { %v5097_v0 = vpop.f32.mrf.mxu0  ;;  %v2726_v26 = vadd.f32 %v5080_v51, %v2300_v34  ;;  %v2724_v21 = vadd.f32 %v5239_v39, %v2298_v30  ;;  %v2729_v51 = vadd.f32 %v5085_v15, %v2303_v56 }
 0x16d   : > { %v2728_v20 = vadd.f32 %v3993_v25, %v2302_v27  ;;  %v2296_v40 = vadd.f32 %v5233_v2, %v2053_v18  ;;  %v5235_v25 = vld [vmem:[#allocation4_spill] sm:$0xff]  ;;  %v5240_v18 = vld [vmem:[#allocation13_spill] sm:$0xff]  ;;  %v2727_v27 = vadd.f32 %v5092_v44, %v2301_v17  ;;  %v2297_v34 = vadd.f32 %v5242_v12, %v2054_v11 }
 0x16e   : > { %v5107_v47 = vpop.f32.mrf.mxu0  ;;  %v2061_v14 = vadd.f32 %v5235_v25, %v1763_v62  ;;  %v2307_v44 = vadd.f32 %v5097_v0, %v2064_v1 }
 0x16f   : > { %v5105_v31 = vpop.f32.mrf.mxu1  ;;  %v2722_v23 = vadd.f32 %v5240_v18, %v2296_v40  ;;  %v2305_v56 = vadd.f32 %v5107_v47, %v2062_v24 }
 0x170   : > { %v5238_v49 = vld [vmem:[#allocation17_spill] sm:$0xff]  ;;  %v2304_v61 = vadd.f32 %v5088_v10, %v2061_v14 }
 0x171   : > { %v5113_v16 = vpop.f32.mrf.mxu1  ;;  %v4017_v28 = vpop.f32.mrf.mxu0  ;;  %v2306_v35 = vadd.f32 %v5238_v49, %v2063_v59  ;;  %v5244_v59 = vld [vmem:[#allocation16_spill] sm:$0xff] }
 0x172   : > { %v3018_v41 = vadd.f32 %v4017_v28, %v2720_v3  ;;  %v2299_v3 = vadd.f32 %v5241_v22, %v2056_v63  ;;  %v2723_v2 = vadd.f32 %v5244_v59, %v2297_v34 }
 0x173   : > { %v5123_v45 = vpop.f32.mrf.mxu1  ;;  %v2953_v36 = vpop.f32.mrf.mxu0  ;;  %v2732_v63 = vadd.f32 %v5105_v31, %v2306_v35 }
 0x174   : > { %3034 = vst [vmem:[%s5128_s19 + $0x10] sm:$0xff] %v3018_v41  ;;  %v3016_v13 = vadd.f32 %v2953_v36, %v2718_v33  ;;  %v3071_v7 = vmul.f32 %v3018_v41, %v3018_v41  ;;  %v2725_v30 = vadd.f32 %v5243_v38, %v2299_v3  ;;  %v2733_v40 = vadd.f32 %v5123_v45, %v2307_v44 }
 0x175   : > { %v5137_v29 = vpop.f32.mrf.mxu1  ;;  %v4018_v58 = vpop.f32.mrf.mxu0 }
 0x176   : > { %3032 = vst [vmem:[%s5128_s19] sm:$0xff] %v3016_v13  ;;  %v3019_v50 = vadd.f32 %v4018_v58, %v2721_v4  ;;  %v3069_v43 = vmul.f32 %v3016_v13, %v3016_v13  ;;  %v2731_v25 = vadd.f32 %v5137_v29, %v2305_v56 }
 0x177   : > { %v4025_v5 = vpop.f32.mrf.mxu1  ;;  %v2956_v48 = vpop.f32.mrf.mxu0 }
 0x178   : > { %v5146_v6 = vadd.f32 %v4025_v5, %v2728_v20  ;;  %3035 = vst [vmem:[%s5128_s19 + $0x18] sm:$0xff] %v3019_v50  ;;  %v3017_v52 = vadd.f32 %v2956_v48, %v2719_v42  ;;  %v2730_v20 = vadd.f32 %v5113_v16, %v2304_v61  ;;  %v3072_v54 = vmul.f32 %v3019_v50, %v3019_v50 }
 0x179   : > { %v2985_v9 = vpop.f32.mrf.mxu1  ;;  %v4021_v8 = vpop.f32.mrf.mxu0 }
 0x17a   : > { %3042 = vst [vmem:[%s5128_s19 + $0x50] sm:$0xff] %v5146_v6  ;;  %v5157_v53 = vadd.f32 %v2985_v9, %v2726_v26  ;;  %3033 = vst [vmem:[%s5128_s19 + $0x8] sm:$0xff] %v3017_v52  ;;  %v3048_v28 = vadd.f32 %v3017_v52, %v3016_v13  ;;  %v3070_v33 = vmul.f32 %v3017_v52, %v3017_v52 }
 0x17b   : > { %v4026_v46 = vpop.f32.mrf.mxu1  ;;  %v3022_v10 = vadd.f32 %v4021_v8, %v2724_v21  ;;  %v2969_v37 = vpop.f32.mrf.mxu0  ;;  %v3079_v3 = vmul.f32 %v5146_v6, %v5146_v6 }
 0x17c   : > { %3040 = vst [vmem:[%s5128_s19 + $0x40] sm:$0xff] %v5157_v53  ;;  %v5166_v15 = vadd.f32 %v4026_v46, %v2729_v51  ;;  %v3049_v32 = vadd.f32 %v3048_v28, %v3018_v41  ;;  %v3085_v4 = vadd.f32 %v3070_v33, %v3069_v43  ;;  %v3020_v31 = vadd.f32 %v2969_v37, %v2722_v23 }
 0x17d   : > { %v2988_v62 = vpop.f32.mrf.mxu1  ;;  %3038 = vst [vmem:[%s5128_s19 + $0x30] sm:$0xff] %v3022_v10  ;;  %v4022_v13 = vpop.f32.mrf.mxu0  ;;  %v3075_v49 = vmul.f32 %v3022_v10, %v3022_v10  ;;  %v3077_v51 = vmul.f32 %v5157_v53, %v5157_v53 }
 0x17e   : > { %3043 = vst [vmem:[%s5128_s19 + $0x58] sm:$0xff] %v5166_v15  ;;  %v3025_v36 = vadd.f32 %v2988_v62, %v2727_v27  ;;  %v3086_v11 = vadd.f32 %v3085_v4, %v3071_v7  ;;  %v3050_v41 = vadd.f32 %v3049_v32, %v3019_v50  ;;  %3036 = vst [vmem:[%s5128_s19 + $0x20] sm:$0xff] %v3020_v31 }
 0x17f   : > { %v4029_v0 = vpop.f32.mrf.mxu1  ;;  %v3023_v47 = vadd.f32 %v4022_v13, %v2725_v30  ;;  %v2972_v17 = vpop.f32.mrf.mxu0  ;;  %v3073_v58 = vmul.f32 %v3020_v31, %v3020_v31  ;;  %v3080_v46 = vmul.f32 %v5166_v15, %v5166_v15 }
 0x180   : > { %3041 = vst [vmem:[%s5128_s19 + $0x48] sm:$0xff] %v3025_v36  ;;  %v3030_v55 = vadd.f32 %v4029_v0, %v2732_v63  ;;  %v3051_v5 = vadd.f32 %v3050_v41, %v3020_v31  ;;  %v3087_v60 = vadd.f32 %v3086_v11, %v3072_v54  ;;  %v3021_v50 = vadd.f32 %v2972_v17, %v2723_v2 }
 0x181   : > { %v3001_v16 = vpop.f32.mrf.mxu1  ;;  %3039 = vst [vmem:[%s5128_s19 + $0x38] sm:$0xff] %v3023_v47  ;;  %v3076_v48 = vmul.f32 %v3023_v47, %v3023_v47  ;;  %v3078_v18 = vmul.f32 %v3025_v36, %v3025_v36 }
 0x182   : > { %3046 = vst [vmem:[%s5128_s19 + $0x70] sm:$0xff] %v3030_v55  ;;  %v3028_v42 = vadd.f32 %v3001_v16, %v2730_v20  ;;  %v3088_v14 = vadd.f32 %v3087_v60, %v3073_v58  ;;  %3037 = vst [vmem:[%s5128_s19 + $0x28] sm:$0xff] %v3021_v50  ;;  %v3052_v19 = vadd.f32 %v3051_v5, %v3021_v50 }
 0x183   : > { %v4030_v26 = vpop.f32.mrf.mxu1  ;;  %v3074_v1 = vmul.f32 %v3021_v50, %v3021_v50  ;;  %v3083_v44 = vmul.f32 %v3030_v55, %v3030_v55 }
 0x184   : > { %3044 = vst [vmem:[%s5128_s19 + $0x60] sm:$0xff] %v3028_v42  ;;  %v3031_v45 = vadd.f32 %v4030_v26, %v2733_v40  ;;  %v3053_v35 = vadd.f32 %v3052_v19, %v3022_v10  ;;  %v3081_v28 = vmul.f32 %v3028_v42, %v3028_v42 }
 0x185   : > { %v3004_v57 = vpop.f32.mrf.mxu1  ;;  %v3089_v9 = vadd.f32 %v3088_v14, %v3074_v1 }
 0x186   : > { %3047 = vst [vmem:[%s5128_s19 + $0x78] sm:$0xff] %v3031_v45  ;;  %v3029_v24 = vadd.f32 %v3004_v57, %v2731_v25  ;;  %v3054_v39 = vadd.f32 %v3053_v35, %v3023_v47  ;;  %v3084_v37 = vmul.f32 %v3031_v45, %v3031_v45 }
 0x187   : > { %v3090_v21 = vadd.f32 %v3089_v9, %v3075_v49 }
 0x188   : > { %3045 = vst [vmem:[%s5128_s19 + $0x68] sm:$0xff] %v3029_v24  ;;  %v3055_v29 = vadd.f32 %v3054_v39, %v5157_v53  ;;  %v3082_v34 = vmul.f32 %v3029_v24, %v3029_v24 }
 0x189   : > { %v3091_v52 = vadd.f32 %v3090_v21, %v3076_v48 }
 0x18a   : > { %v3056_v22 = vadd.f32 %v3055_v29, %v3025_v36 }
 0x18b   : > { %v3092_v23 = vadd.f32 %v3091_v52, %v3077_v51 }
 0x18c   : > { %v3057_v27 = vadd.f32 %v3056_v22, %v5146_v6 }
 0x18d   : > { %v3093_v61 = vadd.f32 %v3092_v23, %v3078_v18 }
 0x18e   : > { %v3058_v8 = vadd.f32 %v3057_v27, %v5166_v15 }
 0x18f   : > { %v3094_v43 = vadd.f32 %v3093_v61, %v3079_v3 }
 0x190   : > { %v3059_v33 = vadd.f32 %v3058_v8, %v3028_v42 }
 0x191   : > { %v3095_v12 = vadd.f32 %v3094_v43, %v3080_v46 }
 0x192   : > { %v3060_v53 = vadd.f32 %v3059_v33, %v3029_v24 }
 0x193   : > { %v3096_v63 = vadd.f32 %v3095_v12, %v3081_v28 }
 0x194   : > { %v3061_v62 = vadd.f32 %v3060_v53, %v3030_v55 }
 0x195   : > { %v3097_v10 = vadd.f32 %v3096_v63, %v3082_v34 }
 0x196   : > { %v3062_v7 = vadd.f32 %v3061_v62, %v3031_v45 }
 0x197   : > { %v3098_v6 = vadd.f32 %v3097_v10, %v3083_v44 }
 0x198   : > { %v3063_v32 = vrot.slane %v3062_v7, 4 }
 0x199   : > { %v3099_v4 = vadd.f32 %v3098_v6, %v3084_v37 }
 0x19a   : > { %v3064_v36 = vadd.f32 %v3063_v32, %v3062_v7 }
 0x19b   : > { %v3100_v38 = vrot.slane %v3099_v4, 4 }
 0x19c   : > { %v3065_v30 = vrot.slane %v3064_v36, 2 }
 0x19d   : > { %v3101_v15 = vadd.f32 %v3100_v38, %v3099_v4 }
 0x19e   : > { %v3066_v20 = vadd.f32 %v3065_v30, %v3064_v36 }
 0x19f   : > { %v3102_v56 = vrot.slane %v3101_v15, 2 }
 0x1a0   : > { %v3067_v0 = vrot.slane %v3066_v20, 1 }
 0x1a1   : > { %v3103_v31 = vadd.f32 %v3102_v56, %v3101_v15 }
 0x1a2   : > { %v3068_v54 = vadd.f32 %v3067_v0, %v3066_v20 }
 0x1a3   : > { %v3104_v13 = vrot.slane %v3103_v31, 1 }
 0x1a5   : > { %v3105_v11 = vadd.f32 %v3104_v13, %v3103_v31 }
 0x1a7   : > { %v3107_v55 = vsel %vm3106_vm6, %v3068_v54, %v3105_v11 }
 0x1a8   : > { %3108 = vst [vmem:[%s181_s23] sm:$0x3] %v3107_v55 }
 0x1a9 PF: > { %s14_s12 = sadd.s32 1, %s4158_s12  }
 0x1aa   : > { %p11_p4 = scmp.ge.s32.totalorder %s14_s12, 6  }
 0x1ac   :  { %13 = sbr.rel (!%p11_p4) target bundleno = 1 (0x1), region = 80 }

</bundles_post_ra>
